<compile_context>
chip_gen: v5e
topology: v5e:2x2
jax: 0.10.0
libtpu: 0.0.40
codegen_flags: <defaults>
</compile_context>

<pallas_src>
import functools
import math

import jax
import jax.numpy as jnp
from jax.experimental import pallas as pl
from jax.experimental.pallas import tpu as pltpu


def _cdiv(a, b):
    return -(-a // b)


def _device_kind():
    try:
        return jax.devices()[0].device_kind.lower()
    except Exception:
        return ""


def _compute_dtype():
    # bf16 VALU/MXU is native on v6e/v7x; keep f32 on older chips (no bf16 VPU).
    kind = _device_kind()
    for old in ("v2", "v3", "v4", "v5"):
        if old in kind:
            return jnp.float32
    return jnp.bfloat16


def _vmem_limit_bytes():
    # v5e/v6e have 128 MiB physical VMEM -> 64 MiB scoped limit is safe;
    # v7x has only 64 MiB per TensorCore -> stay at 32 MiB (also the default
    # for unknown chips).
    kind = _device_kind()
    for big in ("v4", "v5", "v6"):
        if big in kind:
            return 64 * 1024 * 1024
    return 32 * 1024 * 1024


def _pick_batch_block(n, h, w, vmem_limit_bytes):
    """Images per grid step: amortize the ~0.35us/step overhead while staying
    inside the scoped VMEM budget and keeping >=2 (preferably even) grid steps
    so both v7x TensorCores get work under dimension_semantics=("parallel",)."""
    plane = h * w * 4
    per_img = 16 * plane                       # ~peak live f32 planes + dbl-buffered input
    budget = int(vmem_limit_bytes * 0.5)
    cap = max(1, budget // max(per_img, 1))
    if n >= 2:
        cap = min(cap, max(1, n // 2))         # keep >= 2 grid steps
    cap = min(cap, n, 64)
    for cand in range(cap, 0, -1):             # prefer exact divisor or even #steps
        g = _cdiv(n, cand)
        if n % cand == 0 or g % 2 == 0:
            return cand
    return 1


def _hog_kernel(x_ref, pr_ref, o_ref, *, nbins, pool, max_angle, cdt, simple_wrap):
    B, H, W = x_ref.shape
    hp = H // pool
    wp = pr_ref.shape[1]
    Hc = hp * pool                              # AvgPool2d(ceil_mode=False) drops tail rows

    x = x_ref[...].astype(jnp.float32)

    # --- padding=1 realized as XLU rolls + boundary masks (no lane concats,
    #     no (H+2)-row temporary).
    lane = jax.lax.broadcasted_iota(jnp.int32, (B, H, W), 2)
    row = jax.lax.broadcasted_iota(jnp.int32, (B, H, W), 1)
    s_l = jnp.where(lane == 0, 0.0, pltpu.roll(x, shift=1, axis=2))           # x[.., j-1]
    s_r = jnp.where(lane == W - 1, 0.0, pltpu.roll(x, shift=W - 1, axis=2))   # x[.., j+1]

    # --- Sobel cross-correlation (F.conv2d semantics, stride=1, pad=1, dil=1)
    #     gx weight [[1,0,-1],[2,0,-2],[1,0,-1]]; gy weight = its transpose.
    d = s_l - s_r                               # horizontal difference
    t = s_l + 2.0 * x + s_r                     # horizontal smoothing
    d_u = jnp.where(row == 0, 0.0, pltpu.roll(d, shift=1, axis=1))            # d[.., i-1, :]
    d_d = jnp.where(row == H - 1, 0.0, pltpu.roll(d, shift=H - 1, axis=1))    # d[.., i+1, :]
    t_u = jnp.where(row == 0, 0.0, pltpu.roll(t, shift=1, axis=1))
    t_d = jnp.where(row == H - 1, 0.0, pltpu.roll(t, shift=H - 1, axis=1))
    gx = d_u + 2.0 * d + d_d
    gy = t_u - t_d

    # --- magnitude / phase (matches gxy.norm(dim=1), atan2(gxy[:,0], gxy[:,1]))
    mag = jnp.sqrt(gx * gx + gy * gy)
    phase_bins = jnp.arctan2(gx, gy) * (float(nbins) / float(max_angle))
    flf = jnp.floor(phase_bins)
    is_int = phase_bins == flf                  # floor == ceil (exact-integer phase)
    fl = flf.astype(jnp.int32)
    if simple_wrap:                             # phase_bins in [-nbins, nbins]
        fl = jnp.where(fl < 0, fl + nbins, fl)
        fl = jnp.where(fl >= nbins, fl - nbins, fl)
    else:                                       # general max_angle: true floor-mod
        fl = jnp.mod(fl, nbins)

    # scatter_ / scatter_add_ folded into one deposit pair per pixel:
    #   floor-bin   gets val_floor = mag      (or 1 if floor == ceil)
    #   floor-bin+1 gets val_ceil  = 1 - mag  (or 0 if floor == ceil)
    val_floor = jnp.where(is_int, 1.0, mag).astype(cdt)
    val_ceil = jnp.where(is_int, 0.0, 1.0 - mag).astype(cdt)
    fl_c = fl.astype(cdt)                       # 0..nbins-1, exact in bf16

    if Hc != H:                                 # floor-mode pooling row truncation
        val_floor = val_floor[:, :Hc, :]
        val_ceil = val_ceil[:, :Hc, :]
        fl_c = fl_c[:, :Hc, :]

    vf = val_floor.reshape(B * Hc, W)
    vc = val_ceil.reshape(B * Hc, W)
    fb = fl_c.reshape(B * Hc, W)
    prm = pr_ref[...].astype(cdt)               # 0/1 column-pool matrix (W, wp)

    def _pool(plane):                           # (B*Hc, W) -> (B, hp, wp), f32 accum
        cp = jnp.dot(plane, prm, preferred_element_type=jnp.float32)    # column pool on MXU
        return cp.reshape(B, hp, pool, wp).sum(axis=2)                  # tiny row pool

    # One compare per bin, reused for the floor deposit of bin b and the ceil
    # deposit of bin (b+1) % nbins; each bin plane is pooled immediately so
    # only small (B, hp, wp) results stay live.
    outs = [None] * nbins
    m_first = fb == 0
    m_prev = m_first
    for b in range(1, nbins):
        m_b = fb == b
        plane = jnp.where(m_b, vf, 0.0) + jnp.where(m_prev, vc, 0.0)
        outs[b] = _pool(plane)
        m_prev = m_b
    plane = jnp.where(m_first, vf, 0.0) + jnp.where(m_prev, vc, 0.0)
    outs[0] = _pool(plane)

    res = jnp.concatenate(outs, axis=1) * (1.0 / (pool * pool))         # AvgPool scale (f32)
    o_ref[...] = res.astype(o_ref.dtype)        # single store of the whole block


def hog_forward(x, *, nbins=10, pool=8, max_angle=math.pi):
    """Pallas TPU equivalent of HOGLayer_previous.forward
    (stride=1, padding=1, dilation=1, AvgPool2d(pool, pool, ceil_mode=False))."""
    n, c, h, w = x.shape
    assert c == 1, "HOGLayer_previous's conv weight (2,1,3,3) requires 1 input channel"
    hp, wp = h // pool, w // pool
    assert hp >= 1 and wp >= 1, "spatial dims must be >= pool"

    cdt = _compute_dtype()
    vmem_limit = _vmem_limit_bytes()
    b_blk = _pick_batch_block(n, h, w, vmem_limit)
    grid = (_cdiv(n, b_blk),)                   # non-divisor tails are masked by Pallas

    x2 = x[:, 0]                                # (n, h, w); channel squeeze

    # constant 0/1 column-pooling matrix (grid-invariant); averaging scale is
    # applied in f32 inside the kernel so bf16 stays exact.
    col = jnp.arange(w, dtype=jnp.int32)[:, None]
    out_col = jnp.arange(wp, dtype=jnp.int32)[None, :]
    p_right = (col // pool == out_col).astype(jnp.float32)              # (w, wp)

    kernel = functools.partial(
        _hog_kernel, nbins=nbins, pool=pool, max_angle=max_angle, cdt=cdt,
        simple_wrap=(math.pi / max_angle) <= 1.0 + 1e-9)

    out = pl.pallas_call(
        kernel,
        out_shape=jax.ShapeDtypeStruct((n, nbins * hp, wp), jnp.float32),
        grid=grid,
        in_specs=[pl.BlockSpec((b_blk, h, w), lambda i: (i, 0, 0)),
                  pl.BlockSpec((w, wp), lambda i: (0, 0))],
        out_specs=pl.BlockSpec((b_blk, nbins * hp, wp), lambda i: (i, 0, 0)),
        compiler_params=pltpu.CompilerParams(
            dimension_semantics=("parallel",),
            vmem_limit_bytes=vmem_limit),
    )(x2, p_right)
    return out.reshape(n, nbins, hp, wp)


def _hog_reference(x, *, nbins=10, pool=8, max_angle=math.pi):
    """Pure-JAX (f32) port of the PyTorch module, for correctness checking."""
    n, c, h, w = x.shape
    sob = jnp.array([[1.0, 0.0, -1.0], [2.0, 0.0, -2.0], [1.0, 0.0, -1.0]], jnp.float32)
    weight = jnp.stack([sob, sob.T])[:, None, :, :]                     # (2,1,3,3)
    gxy = jax.lax.conv_general_dilated(
        x.astype(jnp.float32), weight, window_strides=(1, 1),
        padding=((1, 1), (1, 1)), dimension_numbers=("NCHW", "OIHW", "NCHW"))
    gx, gy = gxy[:, 0], gxy[:, 1]
    mag = jnp.sqrt(gx * gx + gy * gy)
    phase = jnp.arctan2(gx, gy) / max_angle * nbins
    fl = jnp.floor(phase).astype(jnp.int32) % nbins
    ce = jnp.ceil(phase).astype(jnp.int32) % nbins
    bins = jnp.arange(nbins, dtype=jnp.int32)[None, :, None, None]
    hist = (jnp.where(fl[:, None] == bins, mag[:, None], 0.0)
            + jnp.where(ce[:, None] == bins, (1.0 - mag)[:, None], 0.0))
    hp, wp = h // pool, w // pool
    hist = hist[:, :, :hp * pool, :wp * pool]
    return hist.reshape(n, nbins, hp, pool, wp, pool).mean(axis=(3, 5))


if __name__ == "__main__":
    key = jax.random.PRNGKey(0)
    # module implies (N, 1, H, W); H, W divisible by pool=8
    x = jax.random.normal(key, (2, 1, 16, 16), dtype=jnp.float32)
    out = hog_forward(x, nbins=10, pool=8, max_angle=math.pi)
    out = jax.block_until_ready(out)
    assert out.shape == (2, 10, 2, 2), out.shape
    assert bool(jnp.all(jnp.isfinite(out)))
    ref = _hog_reference(x, nbins=10, pool=8, max_angle=math.pi)
    # tolerance covers the optional bf16 histogram path on v6e/v7x
    assert bool(jnp.allclose(out, ref, rtol=3e-2, atol=3e-2)), \
        float(jnp.max(jnp.abs(out - ref)))
    print("KERNEL_OK")
</pallas_src>

<mosaic_0001>
module attributes {stable_mosaic.version = 11 : i64} {
  func.func @_hog_kernel(%arg0: i32, %arg1: memref<1x16x16xf32, #tpu.memory_space<vmem>>, %arg2: memref<16x2xf32, #tpu.memory_space<vmem>>, %arg3: memref<1x20x2xf32, #tpu.memory_space<vmem>>) attributes {dimension_semantics = [#tpu.dimension_semantics<parallel>], iteration_bounds = array<i64: 2>, scalar_prefetch = 0 : i64, scratch_operands = 0 : i64, tpu.core_type = #tpu.core_type<tc>, window_params = [{transform_indices = @transform_0, window_bounds = array<i64: 1, 16, 16>}, {pipeline_mode = #tpu.pipeline_mode<synchronous>, transform_indices = @transform_1, window_bounds = array<i64: 16, 2>}, {transform_indices = @transform_2, window_bounds = array<i64: 1, 20, 2>}]} {
    %c0 = arith.constant 0 : index
    %c0_0 = arith.constant 0 : index
    %c0_1 = arith.constant 0 : index
    %0 = vector.load %arg1[%c0, %c0_0, %c0_1] : memref<1x16x16xf32, #tpu.memory_space<vmem>>, vector<1x16x16xf32>
    %1 = tpu.iota {dimensions = array<i32: 2>} : vector<1x16x16xi32>
    %2 = tpu.iota {dimensions = array<i32: 1>} : vector<1x16x16xi32>
    %c0_i32 = arith.constant 0 : i32
    %3 = vector.broadcast %c0_i32 : i32 to vector<1x16x16xi32>
    %4 = arith.cmpi eq, %1, %3 : vector<1x16x16xi32>
    %c1_i32 = arith.constant 1 : i32
    %5 = tpu.dynamic_rotate %0 by %c1_i32 dim 2 : vector<1x16x16xf32>, i32 -> vector<1x16x16xf32>
    %cst = arith.constant 0.000000e+00 : f32
    %6 = vector.broadcast %cst : f32 to vector<1x16x16xf32>
    %7 = arith.select %4, %6, %5 : vector<1x16x16xi1>, vector<1x16x16xf32>
    %c15_i32 = arith.constant 15 : i32
    %8 = vector.broadcast %c15_i32 : i32 to vector<1x16x16xi32>
    %9 = arith.cmpi eq, %1, %8 : vector<1x16x16xi32>
    %c15_i32_2 = arith.constant 15 : i32
    %10 = tpu.dynamic_rotate %0 by %c15_i32_2 dim 2 : vector<1x16x16xf32>, i32 -> vector<1x16x16xf32>
    %cst_3 = arith.constant 0.000000e+00 : f32
    %11 = vector.broadcast %cst_3 : f32 to vector<1x16x16xf32>
    %12 = arith.select %9, %11, %10 : vector<1x16x16xi1>, vector<1x16x16xf32>
    %13 = arith.subf %7, %12 : vector<1x16x16xf32>
    %cst_4 = arith.constant 2.000000e+00 : f32
    %14 = vector.broadcast %cst_4 : f32 to vector<1x16x16xf32>
    %15 = arith.mulf %14, %0 : vector<1x16x16xf32>
    %16 = arith.addf %7, %15 : vector<1x16x16xf32>
    %17 = arith.addf %16, %12 : vector<1x16x16xf32>
    %c0_i32_5 = arith.constant 0 : i32
    %18 = vector.broadcast %c0_i32_5 : i32 to vector<1x16x16xi32>
    %19 = arith.cmpi eq, %2, %18 : vector<1x16x16xi32>
    %c1_i32_6 = arith.constant 1 : i32
    %20 = tpu.dynamic_rotate %13 by %c1_i32_6 dim 1 : vector<1x16x16xf32>, i32 -> vector<1x16x16xf32>
    %cst_7 = arith.constant 0.000000e+00 : f32
    %21 = vector.broadcast %cst_7 : f32 to vector<1x16x16xf32>
    %22 = arith.select %19, %21, %20 : vector<1x16x16xi1>, vector<1x16x16xf32>
    %c15_i32_8 = arith.constant 15 : i32
    %23 = vector.broadcast %c15_i32_8 : i32 to vector<1x16x16xi32>
    %24 = arith.cmpi eq, %2, %23 : vector<1x16x16xi32>
    %c15_i32_9 = arith.constant 15 : i32
    %25 = tpu.dynamic_rotate %13 by %c15_i32_9 dim 1 : vector<1x16x16xf32>, i32 -> vector<1x16x16xf32>
    %cst_10 = arith.constant 0.000000e+00 : f32
    %26 = vector.broadcast %cst_10 : f32 to vector<1x16x16xf32>
    %27 = arith.select %24, %26, %25 : vector<1x16x16xi1>, vector<1x16x16xf32>
    %c0_i32_11 = arith.constant 0 : i32
    %28 = vector.broadcast %c0_i32_11 : i32 to vector<1x16x16xi32>
    %29 = arith.cmpi eq, %2, %28 : vector<1x16x16xi32>
    %c1_i32_12 = arith.constant 1 : i32
    %30 = tpu.dynamic_rotate %17 by %c1_i32_12 dim 1 : vector<1x16x16xf32>, i32 -> vector<1x16x16xf32>
    %cst_13 = arith.constant 0.000000e+00 : f32
    %31 = vector.broadcast %cst_13 : f32 to vector<1x16x16xf32>
    %32 = arith.select %29, %31, %30 : vector<1x16x16xi1>, vector<1x16x16xf32>
    %c15_i32_14 = arith.constant 15 : i32
    %33 = vector.broadcast %c15_i32_14 : i32 to vector<1x16x16xi32>
    %34 = arith.cmpi eq, %2, %33 : vector<1x16x16xi32>
    %c15_i32_15 = arith.constant 15 : i32
    %35 = tpu.dynamic_rotate %17 by %c15_i32_15 dim 1 : vector<1x16x16xf32>, i32 -> vector<1x16x16xf32>
    %cst_16 = arith.constant 0.000000e+00 : f32
    %36 = vector.broadcast %cst_16 : f32 to vector<1x16x16xf32>
    %37 = arith.select %34, %36, %35 : vector<1x16x16xi1>, vector<1x16x16xf32>
    %cst_17 = arith.constant 2.000000e+00 : f32
    %38 = vector.broadcast %cst_17 : f32 to vector<1x16x16xf32>
    %39 = arith.mulf %38, %13 : vector<1x16x16xf32>
    %40 = arith.addf %22, %39 : vector<1x16x16xf32>
    %41 = arith.addf %40, %27 : vector<1x16x16xf32>
    %42 = arith.subf %32, %37 : vector<1x16x16xf32>
    %43 = arith.mulf %41, %41 : vector<1x16x16xf32>
    %44 = arith.mulf %42, %42 : vector<1x16x16xf32>
    %45 = arith.addf %43, %44 : vector<1x16x16xf32>
    %46 = math.sqrt %45 : vector<1x16x16xf32>
    %47 = math.atan2 %41, %42 : vector<1x16x16xf32>
    %cst_18 = arith.constant 3.18309879 : f32
    %48 = vector.broadcast %cst_18 : f32 to vector<1x16x16xf32>
    %49 = arith.mulf %47, %48 : vector<1x16x16xf32>
    %50 = math.floor %49 : vector<1x16x16xf32>
    %51 = arith.cmpf oeq, %49, %50 : vector<1x16x16xf32>
    %52 = arith.fptosi %50 : vector<1x16x16xf32> to vector<1x16x16xi32>
    %c0_i32_19 = arith.constant 0 : i32
    %53 = vector.broadcast %c0_i32_19 : i32 to vector<1x16x16xi32>
    %54 = arith.cmpi slt, %52, %53 : vector<1x16x16xi32>
    %c10_i32 = arith.constant 10 : i32
    %55 = vector.broadcast %c10_i32 : i32 to vector<1x16x16xi32>
    %56 = arith.addi %52, %55 : vector<1x16x16xi32>
    %57 = arith.select %54, %56, %52 : vector<1x16x16xi1>, vector<1x16x16xi32>
    %c10_i32_20 = arith.constant 10 : i32
    %58 = vector.broadcast %c10_i32_20 : i32 to vector<1x16x16xi32>
    %59 = arith.cmpi sge, %57, %58 : vector<1x16x16xi32>
    %c10_i32_21 = arith.constant 10 : i32
    %60 = vector.broadcast %c10_i32_21 : i32 to vector<1x16x16xi32>
    %61 = arith.subi %57, %60 : vector<1x16x16xi32>
    %62 = arith.select %59, %61, %57 : vector<1x16x16xi1>, vector<1x16x16xi32>
    %cst_22 = arith.constant 1.000000e+00 : f32
    %63 = vector.broadcast %cst_22 : f32 to vector<1x16x16xf32>
    %64 = arith.select %51, %63, %46 : vector<1x16x16xi1>, vector<1x16x16xf32>
    %65 = arith.truncf %64 : vector<1x16x16xf32> to vector<1x16x16xbf16>
    %cst_23 = arith.constant 1.000000e+00 : f32
    %66 = vector.broadcast %cst_23 : f32 to vector<1x16x16xf32>
    %67 = arith.subf %66, %46 : vector<1x16x16xf32>
    %cst_24 = arith.constant 0.000000e+00 : f32
    %68 = vector.broadcast %cst_24 : f32 to vector<1x16x16xf32>
    %69 = arith.select %51, %68, %67 : vector<1x16x16xi1>, vector<1x16x16xf32>
    %70 = arith.truncf %69 : vector<1x16x16xf32> to vector<1x16x16xbf16>
    %71 = arith.sitofp %62 : vector<1x16x16xi32> to vector<1x16x16xbf16>
    %72 = vector.shape_cast %65 : vector<1x16x16xbf16> to vector<16x16xbf16>
    %73 = vector.shape_cast %70 : vector<1x16x16xbf16> to vector<16x16xbf16>
    %74 = vector.shape_cast %71 : vector<1x16x16xbf16> to vector<16x16xbf16>
    %c0_25 = arith.constant 0 : index
    %c0_26 = arith.constant 0 : index
    %75 = vector.load %arg2[%c0_25, %c0_26] : memref<16x2xf32, #tpu.memory_space<vmem>>, vector<16x2xf32>
    %76 = arith.truncf %75 : vector<16x2xf32> to vector<16x2xbf16>
    %cst_27 = arith.constant 0.000000e+00 : bf16
    %77 = vector.broadcast %cst_27 : bf16 to vector<16x16xbf16>
    %78 = arith.cmpf oeq, %74, %77 : vector<16x16xbf16>
    %cst_28 = arith.constant 1.000000e+00 : bf16
    %79 = vector.broadcast %cst_28 : bf16 to vector<16x16xbf16>
    %80 = arith.cmpf oeq, %74, %79 : vector<16x16xbf16>
    %cst_29 = arith.constant 0.000000e+00 : f32
    %81 = arith.truncf %cst_29 : f32 to bf16
    %82 = vector.broadcast %81 : bf16 to vector<16x16xbf16>
    %83 = arith.select %80, %72, %82 : vector<16x16xi1>, vector<16x16xbf16>
    %cst_30 = arith.constant 0.000000e+00 : f32
    %84 = arith.truncf %cst_30 : f32 to bf16
    %85 = vector.broadcast %84 : bf16 to vector<16x16xbf16>
    %86 = arith.select %78, %73, %85 : vector<16x16xi1>, vector<16x16xbf16>
    %87 = arith.addf %83, %86 : vector<16x16xbf16>
    %cst_31 = arith.constant dense<0.000000e+00> : vector<16x2xf32>
    %88 = tpu.matmul %87, %76, %cst_31 {dimension_numbers = #tpu.dot_dimension_numbers<[1], [0], [0], [1], [0, 0, 1, 1], [], []>} : vector<16x16xbf16>, vector<16x2xbf16>, vector<16x2xf32> -> vector<16x2xf32>
    %89 = vector.shape_cast %88 : vector<16x2xf32> to vector<1x2x8x2xf32>
    %cst_32 = arith.constant dense<0.000000e+00> : vector<1x2x2xf32>
    %90 = vector.multi_reduction <add>, %89, %cst_32 [2] : vector<1x2x8x2xf32> to vector<1x2x2xf32>
    %cst_33 = arith.constant 2.000000e+00 : bf16
    %91 = vector.broadcast %cst_33 : bf16 to vector<16x16xbf16>
    %92 = arith.cmpf oeq, %74, %91 : vector<16x16xbf16>
    %cst_34 = arith.constant 0.000000e+00 : f32
    %93 = arith.truncf %cst_34 : f32 to bf16
    %94 = vector.broadcast %93 : bf16 to vector<16x16xbf16>
    %95 = arith.select %92, %72, %94 : vector<16x16xi1>, vector<16x16xbf16>
    %cst_35 = arith.constant 0.000000e+00 : f32
    %96 = arith.truncf %cst_35 : f32 to bf16
    %97 = vector.broadcast %96 : bf16 to vector<16x16xbf16>
    %98 = arith.select %80, %73, %97 : vector<16x16xi1>, vector<16x16xbf16>
    %99 = arith.addf %95, %98 : vector<16x16xbf16>
    %cst_36 = arith.constant dense<0.000000e+00> : vector<16x2xf32>
    %100 = tpu.matmul %99, %76, %cst_36 {dimension_numbers = #tpu.dot_dimension_numbers<[1], [0], [0], [1], [0, 0, 1, 1], [], []>} : vector<16x16xbf16>, vector<16x2xbf16>, vector<16x2xf32> -> vector<16x2xf32>
    %101 = vector.shape_cast %100 : vector<16x2xf32> to vector<1x2x8x2xf32>
    %cst_37 = arith.constant dense<0.000000e+00> : vector<1x2x2xf32>
    %102 = vector.multi_reduction <add>, %101, %cst_37 [2] : vector<1x2x8x2xf32> to vector<1x2x2xf32>
    %cst_38 = arith.constant 3.000000e+00 : bf16
    %103 = vector.broadcast %cst_38 : bf16 to vector<16x16xbf16>
    %104 = arith.cmpf oeq, %74, %103 : vector<16x16xbf16>
    %cst_39 = arith.constant 0.000000e+00 : f32
    %105 = arith.truncf %cst_39 : f32 to bf16
    %106 = vector.broadcast %105 : bf16 to vector<16x16xbf16>
    %107 = arith.select %104, %72, %106 : vector<16x16xi1>, vector<16x16xbf16>
    %cst_40 = arith.constant 0.000000e+00 : f32
    %108 = arith.truncf %cst_40 : f32 to bf16
    %109 = vector.broadcast %108 : bf16 to vector<16x16xbf16>
    %110 = arith.select %92, %73, %109 : vector<16x16xi1>, vector<16x16xbf16>
    %111 = arith.addf %107, %110 : vector<16x16xbf16>
    %cst_41 = arith.constant dense<0.000000e+00> : vector<16x2xf32>
    %112 = tpu.matmul %111, %76, %cst_41 {dimension_numbers = #tpu.dot_dimension_numbers<[1], [0], [0], [1], [0, 0, 1, 1], [], []>} : vector<16x16xbf16>, vector<16x2xbf16>, vector<16x2xf32> -> vector<16x2xf32>
    %113 = vector.shape_cast %112 : vector<16x2xf32> to vector<1x2x8x2xf32>
    %cst_42 = arith.constant dense<0.000000e+00> : vector<1x2x2xf32>
    %114 = vector.multi_reduction <add>, %113, %cst_42 [2] : vector<1x2x8x2xf32> to vector<1x2x2xf32>
    %cst_43 = arith.constant 4.000000e+00 : bf16
    %115 = vector.broadcast %cst_43 : bf16 to vector<16x16xbf16>
    %116 = arith.cmpf oeq, %74, %115 : vector<16x16xbf16>
    %cst_44 = arith.constant 0.000000e+00 : f32
    %117 = arith.truncf %cst_44 : f32 to bf16
    %118 = vector.broadcast %117 : bf16 to vector<16x16xbf16>
    %119 = arith.select %116, %72, %118 : vector<16x16xi1>, vector<16x16xbf16>
    %cst_45 = arith.constant 0.000000e+00 : f32
    %120 = arith.truncf %cst_45 : f32 to bf16
    %121 = vector.broadcast %120 : bf16 to vector<16x16xbf16>
    %122 = arith.select %104, %73, %121 : vector<16x16xi1>, vector<16x16xbf16>
    %123 = arith.addf %119, %122 : vector<16x16xbf16>
    %cst_46 = arith.constant dense<0.000000e+00> : vector<16x2xf32>
    %124 = tpu.matmul %123, %76, %cst_46 {dimension_numbers = #tpu.dot_dimension_numbers<[1], [0], [0], [1], [0, 0, 1, 1], [], []>} : vector<16x16xbf16>, vector<16x2xbf16>, vector<16x2xf32> -> vector<16x2xf32>
    %125 = vector.shape_cast %124 : vector<16x2xf32> to vector<1x2x8x2xf32>
    %cst_47 = arith.constant dense<0.000000e+00> : vector<1x2x2xf32>
    %126 = vector.multi_reduction <add>, %125, %cst_47 [2] : vector<1x2x8x2xf32> to vector<1x2x2xf32>
    %cst_48 = arith.constant 5.000000e+00 : bf16
    %127 = vector.broadcast %cst_48 : bf16 to vector<16x16xbf16>
    %128 = arith.cmpf oeq, %74, %127 : vector<16x16xbf16>
    %cst_49 = arith.constant 0.000000e+00 : f32
    %129 = arith.truncf %cst_49 : f32 to bf16
    %130 = vector.broadcast %129 : bf16 to vector<16x16xbf16>
    %131 = arith.select %128, %72, %130 : vector<16x16xi1>, vector<16x16xbf16>
    %cst_50 = arith.constant 0.000000e+00 : f32
    %132 = arith.truncf %cst_50 : f32 to bf16
    %133 = vector.broadcast %132 : bf16 to vector<16x16xbf16>
    %134 = arith.select %116, %73, %133 : vector<16x16xi1>, vector<16x16xbf16>
    %135 = arith.addf %131, %134 : vector<16x16xbf16>
    %cst_51 = arith.constant dense<0.000000e+00> : vector<16x2xf32>
    %136 = tpu.matmul %135, %76, %cst_51 {dimension_numbers = #tpu.dot_dimension_numbers<[1], [0], [0], [1], [0, 0, 1, 1], [], []>} : vector<16x16xbf16>, vector<16x2xbf16>, vector<16x2xf32> -> vector<16x2xf32>
    %137 = vector.shape_cast %136 : vector<16x2xf32> to vector<1x2x8x2xf32>
    %cst_52 = arith.constant dense<0.000000e+00> : vector<1x2x2xf32>
    %138 = vector.multi_reduction <add>, %137, %cst_52 [2] : vector<1x2x8x2xf32> to vector<1x2x2xf32>
    %cst_53 = arith.constant 6.000000e+00 : bf16
    %139 = vector.broadcast %cst_53 : bf16 to vector<16x16xbf16>
    %140 = arith.cmpf oeq, %74, %139 : vector<16x16xbf16>
    %cst_54 = arith.constant 0.000000e+00 : f32
    %141 = arith.truncf %cst_54 : f32 to bf16
    %142 = vector.broadcast %141 : bf16 to vector<16x16xbf16>
    %143 = arith.select %140, %72, %142 : vector<16x16xi1>, vector<16x16xbf16>
    %cst_55 = arith.constant 0.000000e+00 : f32
    %144 = arith.truncf %cst_55 : f32 to bf16
    %145 = vector.broadcast %144 : bf16 to vector<16x16xbf16>
    %146 = arith.select %128, %73, %145 : vector<16x16xi1>, vector<16x16xbf16>
    %147 = arith.addf %143, %146 : vector<16x16xbf16>
    %cst_56 = arith.constant dense<0.000000e+00> : vector<16x2xf32>
    %148 = tpu.matmul %147, %76, %cst_56 {dimension_numbers = #tpu.dot_dimension_numbers<[1], [0], [0], [1], [0, 0, 1, 1], [], []>} : vector<16x16xbf16>, vector<16x2xbf16>, vector<16x2xf32> -> vector<16x2xf32>
    %149 = vector.shape_cast %148 : vector<16x2xf32> to vector<1x2x8x2xf32>
    %cst_57 = arith.constant dense<0.000000e+00> : vector<1x2x2xf32>
    %150 = vector.multi_reduction <add>, %149, %cst_57 [2] : vector<1x2x8x2xf32> to vector<1x2x2xf32>
    %cst_58 = arith.constant 7.000000e+00 : bf16
    %151 = vector.broadcast %cst_58 : bf16 to vector<16x16xbf16>
    %152 = arith.cmpf oeq, %74, %151 : vector<16x16xbf16>
    %cst_59 = arith.constant 0.000000e+00 : f32
    %153 = arith.truncf %cst_59 : f32 to bf16
    %154 = vector.broadcast %153 : bf16 to vector<16x16xbf16>
    %155 = arith.select %152, %72, %154 : vector<16x16xi1>, vector<16x16xbf16>
    %cst_60 = arith.constant 0.000000e+00 : f32
    %156 = arith.truncf %cst_60 : f32 to bf16
    %157 = vector.broadcast %156 : bf16 to vector<16x16xbf16>
    %158 = arith.select %140, %73, %157 : vector<16x16xi1>, vector<16x16xbf16>
    %159 = arith.addf %155, %158 : vector<16x16xbf16>
    %cst_61 = arith.constant dense<0.000000e+00> : vector<16x2xf32>
    %160 = tpu.matmul %159, %76, %cst_61 {dimension_numbers = #tpu.dot_dimension_numbers<[1], [0], [0], [1], [0, 0, 1, 1], [], []>} : vector<16x16xbf16>, vector<16x2xbf16>, vector<16x2xf32> -> vector<16x2xf32>
    %161 = vector.shape_cast %160 : vector<16x2xf32> to vector<1x2x8x2xf32>
    %cst_62 = arith.constant dense<0.000000e+00> : vector<1x2x2xf32>
    %162 = vector.multi_reduction <add>, %161, %cst_62 [2] : vector<1x2x8x2xf32> to vector<1x2x2xf32>
    %cst_63 = arith.constant 8.000000e+00 : bf16
    %163 = vector.broadcast %cst_63 : bf16 to vector<16x16xbf16>
    %164 = arith.cmpf oeq, %74, %163 : vector<16x16xbf16>
    %cst_64 = arith.constant 0.000000e+00 : f32
    %165 = arith.truncf %cst_64 : f32 to bf16
    %166 = vector.broadcast %165 : bf16 to vector<16x16xbf16>
    %167 = arith.select %164, %72, %166 : vector<16x16xi1>, vector<16x16xbf16>
    %cst_65 = arith.constant 0.000000e+00 : f32
    %168 = arith.truncf %cst_65 : f32 to bf16
    %169 = vector.broadcast %168 : bf16 to vector<16x16xbf16>
    %170 = arith.select %152, %73, %169 : vector<16x16xi1>, vector<16x16xbf16>
    %171 = arith.addf %167, %170 : vector<16x16xbf16>
    %cst_66 = arith.constant dense<0.000000e+00> : vector<16x2xf32>
    %172 = tpu.matmul %171, %76, %cst_66 {dimension_numbers = #tpu.dot_dimension_numbers<[1], [0], [0], [1], [0, 0, 1, 1], [], []>} : vector<16x16xbf16>, vector<16x2xbf16>, vector<16x2xf32> -> vector<16x2xf32>
    %173 = vector.shape_cast %172 : vector<16x2xf32> to vector<1x2x8x2xf32>
    %cst_67 = arith.constant dense<0.000000e+00> : vector<1x2x2xf32>
    %174 = vector.multi_reduction <add>, %173, %cst_67 [2] : vector<1x2x8x2xf32> to vector<1x2x2xf32>
    %cst_68 = arith.constant 9.000000e+00 : bf16
    %175 = vector.broadcast %cst_68 : bf16 to vector<16x16xbf16>
    %176 = arith.cmpf oeq, %74, %175 : vector<16x16xbf16>
    %cst_69 = arith.constant 0.000000e+00 : f32
    %177 = arith.truncf %cst_69 : f32 to bf16
    %178 = vector.broadcast %177 : bf16 to vector<16x16xbf16>
    %179 = arith.select %176, %72, %178 : vector<16x16xi1>, vector<16x16xbf16>
    %cst_70 = arith.constant 0.000000e+00 : f32
    %180 = arith.truncf %cst_70 : f32 to bf16
    %181 = vector.broadcast %180 : bf16 to vector<16x16xbf16>
    %182 = arith.select %164, %73, %181 : vector<16x16xi1>, vector<16x16xbf16>
    %183 = arith.addf %179, %182 : vector<16x16xbf16>
    %cst_71 = arith.constant dense<0.000000e+00> : vector<16x2xf32>
    %184 = tpu.matmul %183, %76, %cst_71 {dimension_numbers = #tpu.dot_dimension_numbers<[1], [0], [0], [1], [0, 0, 1, 1], [], []>} : vector<16x16xbf16>, vector<16x2xbf16>, vector<16x2xf32> -> vector<16x2xf32>
    %185 = vector.shape_cast %184 : vector<16x2xf32> to vector<1x2x8x2xf32>
    %cst_72 = arith.constant dense<0.000000e+00> : vector<1x2x2xf32>
    %186 = vector.multi_reduction <add>, %185, %cst_72 [2] : vector<1x2x8x2xf32> to vector<1x2x2xf32>
    %cst_73 = arith.constant 0.000000e+00 : f32
    %187 = arith.truncf %cst_73 : f32 to bf16
    %188 = vector.broadcast %187 : bf16 to vector<16x16xbf16>
    %189 = arith.select %78, %72, %188 : vector<16x16xi1>, vector<16x16xbf16>
    %cst_74 = arith.constant 0.000000e+00 : f32
    %190 = arith.truncf %cst_74 : f32 to bf16
    %191 = vector.broadcast %190 : bf16 to vector<16x16xbf16>
    %192 = arith.select %176, %73, %191 : vector<16x16xi1>, vector<16x16xbf16>
    %193 = arith.addf %189, %192 : vector<16x16xbf16>
    %cst_75 = arith.constant dense<0.000000e+00> : vector<16x2xf32>
    %194 = tpu.matmul %193, %76, %cst_75 {dimension_numbers = #tpu.dot_dimension_numbers<[1], [0], [0], [1], [0, 0, 1, 1], [], []>} : vector<16x16xbf16>, vector<16x2xbf16>, vector<16x2xf32> -> vector<16x2xf32>
    %195 = vector.shape_cast %194 : vector<16x2xf32> to vector<1x2x8x2xf32>
    %cst_76 = arith.constant dense<0.000000e+00> : vector<1x2x2xf32>
    %196 = vector.multi_reduction <add>, %195, %cst_76 [2] : vector<1x2x8x2xf32> to vector<1x2x2xf32>
    %197 = tpu.concatenate %196, %90, %102, %114, %126, %138, %150, %162, %174, %186 in 1 : vector<1x2x2xf32>, vector<1x2x2xf32>, vector<1x2x2xf32>, vector<1x2x2xf32>, vector<1x2x2xf32>, vector<1x2x2xf32>, vector<1x2x2xf32>, vector<1x2x2xf32>, vector<1x2x2xf32>, vector<1x2x2xf32> -> vector<1x20x2xf32>
    %cst_77 = arith.constant 1.562500e-02 : f32
    %198 = vector.broadcast %cst_77 : f32 to vector<1x20x2xf32>
    %199 = arith.mulf %197, %198 : vector<1x20x2xf32>
    %c0_78 = arith.constant 0 : index
    %c0_79 = arith.constant 0 : index
    %c0_80 = arith.constant 0 : index
    %200 = vector.load %arg3[%c0_78, %c0_79, %c0_80] : memref<1x20x2xf32, #tpu.memory_space<vmem>>, vector<1x20x2xf32>
    tpu.vector_store %arg3[%c0_78, %c0_79, %c0_80], %199 {strides = array<i32>} : memref<1x20x2xf32, #tpu.memory_space<vmem>>, vector<1x20x2xf32>,
    return
  }
  func.func @transform_0(%arg0: i32) -> (i32, i32, i32) {
    %c0_i32 = arith.constant 0 : i32
    %c0_i32_0 = arith.constant 0 : i32
    %c0_i32_1 = arith.constant 0 : i32
    return %arg0, %c0_i32, %c0_i32_0 : i32, i32, i32
  }
  func.func @transform_1(%arg0: i32) -> (i32, i32) {
    %c0_i32 = arith.constant 0 : i32
    %c0_i32_0 = arith.constant 0 : i32
    %c0_i32_1 = arith.constant 0 : i32
    return %c0_i32, %c0_i32_0 : i32, i32
  }
  func.func @transform_2(%arg0: i32) -> (i32, i32, i32) {
    %c0_i32 = arith.constant 0 : i32
    %c0_i32_0 = arith.constant 0 : i32
    %c0_i32_1 = arith.constant 0 : i32
    return %arg0, %c0_i32, %c0_i32_0 : i32, i32, i32
  }
}

</mosaic_0001>

<bundles_post_ra>
// kernel: tpu_custom_call.1
= control target key start
LH: loop header
LB: loop body
LE: loop exit
PB: predicated region body
PF: predicated region fallthrough
CT: control target
= control target key end

     0   :  { %7 = vsyncpa [#allocation3], 0  ;;  %s1732_s0 = inlined_call_operand.hbm [shape: f32[2,16,16], index: 0, kind: input, shape index: {}]   ;;  %s1733_s1 = inlined_call_operand.vmem [shape: f32[16,2], index: 1, kind: input, shape index: {}]   ;;  %s1734_s2 = inlined_call_operand.vmem [shape: f32[2,20,2], index: 2, kind: output, shape index: {}]  }
   0x1   :  { %9 = vsyncpa [#allocation3 + $0x1], 0  ;;  %s1203_s9 = smov 0   ;;  %s1205_s10 = smov 0  }
   0x2   :  { %s1207_s11 = smov 0   ;;  %s1209_s12 = smov 0  }
   0x3 LB: > { %s1222_s13 = sadd.s32 4294967295, %s1179_s12   ;;  %s1225_s14 = sadd.s32 1, %s1179_s12   ;;  %s1179_s12 = sphi %s1209_s12, %s1779_s12   ;;  %s1175_s11 = sphi %s1207_s11, %s1778_s11   ;;  %s1171_s10 = sphi %s1205_s10, %s1777_s10   ;;  %s1167_s9 = sphi %s1203_s9, %s1776_s9  }
   0x4   : > { %s19_s15 = ssub.s32 %s1179_s12, %s1225_s14  ;;  %s22_s16 = sadd.s32 1, %s1175_s11 }
   0x5   : > { %p20_p0 = scmp.eq.s32.totalorder %s19_s15, 0  ;;  %p29_p1 = scmp.ne.s32.totalorder %s1175_s11, %s1171_s10 }
   0x6   : > { %p30_p2 = scmp.eq.s32.totalorder %s1179_s12, 0  ;;  %p35_p3 = scmp.ne.s32.totalorder %s1171_s10, %s1167_s9 }
   0x7   : > { %s1235_s17 = scalar_select %p20_p0, %s1175_s11, %s22_s16  }
   0x8   : > { %p1237_p4 = por %p30_p2, %p29_p1  ;;  %p36_p5 = scmp.eq.s32.totalorder %s1222_s13, 0 }
   0x9   : > { %p1067_p6 = scmp.lt.s32.totalorder %s1179_s12, 2  ;;  %s109_s20 = sand.u32 1, %s1175_s11  }
   0xa   : > { %p1243_p7 = por %p36_p5, %p35_p3  ;;  %s1035_s21 = sshll.u32 %s109_s20, 4 }
   0xb   : > { %s1055_s22 = sshll.u32 %s1179_s12, 4  ;;  %s113_s26 = scalar_lea.vmem [#allocation2], %s1035_s21 }
   0xc   : > { %s118_s25 = scalar_lea.hbm %s1732_s0, %s1055_s22  ;;  %s121_s27 = sshll.u32 %s113_s26, 4  ;;  %s122_s27 = int_to_ptr.vmem [resolvable:$true] %s121_s27 }
   0xd   : > { %s119_s28 = sshll.u32 %s118_s25, 4  ;;  %p1254_p8 = pnand %p1067_p6, %p1237_p4  ;;  %s120_s28 = int_to_ptr.hbm [resolvable:$true] %s119_s28 }
   0xe   : > { %p1038_p9 = scmp.ge.s32.totalorder %s1179_s12, 1  ;;  %s110_s30 = scalar_lea.sflag [#allocation3], %s109_s20 }
   0xf   : > { %s1115_s3 = sshra.s32 %s120_s28, 4  ;;  %p1119_p11 = pneg %p1254_p8  ;;  %s1116_s3 = int_to_ptr.hbm [resolvable:$true] %s1115_s3 }
  0x10   : > { %s1117_s4 = scalar_lea.hbm %s1116_s3, 16  ;;  %s1122_s7 = scalar_lea.hbm %s1732_s0, 32 }
  0x11   : > { %p1118_p10 = scmp.ne.s32.totalorder %s1116_s3, %s1117_s4  ;;  %p1123_p0 = scmp.lt.s32.totalorder %s1116_s3, %s1732_s0 }
  0x12   : > { %p1124_p1 = scmp.lt.s32.totalorder %s1122_s7, %s1117_s4 }
  0x13   : > { %p1120_p12 = pnand %p1119_p11, %p1118_p10 }
  0x14   : > { %p1125_p2 = por %p1124_p1, %p1123_p0 }
  0x15   : > { %p1121_p13 = pneg %p1120_p12 }
  0x17   : > { %p1126_p3 = pnand %p1125_p2, %p1121_p13 }
  0x19   : > { %1129 = shalt.err (!%p1126_p3)
}
  0x1a   : > { %s1181_s15 = smov 128   ;;  %s1182_s16 = smov 8  }
  0x1b   : > { %1066 = dma.hbm_to_vmem [thread:$0]  (!%p1254_p8), %s120_s28, 256, %s122_s27, %s110_s30, %s1181_s15, %s1181_s15, %s1182_s16  }
  0x1c   : > { %p129_p4 = scmp.lt.s32.totalorder %s1179_s12, 3 }
  0x1e   : > { %p130_p5 = pnand %p1038_p9, %p129_p4 }
  0x1f   : > { %s135_s18 = sand.u32 (!%p130_p5), 1, %s1171_s10  }
  0x20   : > { %133 = sbr.rel (%p130_p5) target bundleno = 698 (0x2ba), region = 28  ;;  %s1039_s20 = sshll.u32 (!%p130_p5), %s135_s18, 4 }
  0x21   : > { %s136_s21 = scalar_lea.sflag (!%p130_p5), [#allocation3], %s135_s18  ;;  %s139_s22 = scalar_lea.vmem (!%p130_p5), [#allocation2], %s1039_s20 }
  0x25   : > { %1162 = dma.done.wait (%p1243_p7), %s136_s21, 256  }
  0x26   : > { %1164 = vsyncadd (%p1243_p7), %s136_s21, 4294967040  ;;  %v167_v0 = vld [vmem:[%s139_s22] sm:$0xff]  ;;  %s1183_s23 = smov 16   ;;  %v168_v1 = vld [vmem:[%s139_s22 + $0x8] sm:$0xff]  ;;  %vm175_vm0 = vcmask 1047680   ;;  %s1184_s12 = smov 127   ;;  %v169_v11 = vlaneseq }
  0x27   : > { %176 = vrot.lane.b32.xlu0 %v167_v0, %s1183_s23  ;;  %s1185_s24 = smov 113   ;;  %v209_v15 = vmul.f32 2.0, %v167_v0  ;;  %v210_v17 = vmul.f32 2.0, %v168_v1  ;;  %p161_p6 = scmp.lt.s32.totalorder %s1222_s13, 1 }
  0x28   : > { %v170_v12 = vand.u32 127, %v169_v11  ;;  %v172_v19 = vshrl.u32 %v169_v11, 7 }
  0x29   : > { %s1781_s13 = smov (!%p161_p6, %s1222_s13), 1 }
  0x2a   : > { %vm174_vm1 = vcmp.eq.s32.totalorder %v170_v12, 0  ;;  %vm198_vm2 = vcmp.eq.s32.totalorder %v170_v12, 15  ;;  %v173_v26 = vadd.s32 8, %v172_v19  ;;  %vm215_vm3 = vcmp.eq.s32.totalorder %v172_v19, 0  ;;  %s1056_s28 = smul.u32 24, %s1781_s13 }
  0x2b   : > { %vm219_vm4 = vcmp.lt.s32.totalorder %v172_v19, 1  ;;  %vm228_vm6 = vcmp.lt.s32.totalorder %v172_v19, 7 }
  0x2c   : > { %vm225_vm5 = vcmp.eq.s32.totalorder %v173_v26, 15  ;;  %s1690_s30 = scalar_lea.vmem %s1734_s2, %s1056_s28 }
  0x2f   : > { %179 = vrot.lane.b32.xlu0 %v168_v1, %s1183_s23 }
  0x99   : > { %v177_v2 = vpop.permute.xlu0 %176 }
  0x9a   : > { %v178_v3 = vsel %vm175_vm0, %v177_v2, %v167_v0 }
  0x9b   : > { %182 = vrot.lane.b32.xlu1 %v178_v3, %s1183_s23 }
  0xa1   : > { %v180_v4 = vpop.permute.xlu0 %179 }
  0xa2   : > { %v181_v5 = vsel %vm175_vm0, %v180_v4, %v168_v1 }
  0xa3   : > { %184 = vrot.lane.b32.xlu1 %v181_v5, %s1183_s23 }
 0x10d   : > { %v183_v6 = vpop.permute.xlu1 %182 }
 0x10e   : > { %v186_v7 = vsel %vm175_vm0, %v183_v6, %v167_v0 }
 0x10f   : > { %199 = vrot.lane.b32.xlu0 %v186_v7, %s1184_s12  ;;  %190 = vrot.lane.b32.xlu2 %v186_v7, %s1185_s24 }
 0x115   : > { %v185_v8 = vpop.permute.xlu1 %184 }
 0x116   : > { %v187_v9 = vsel %vm175_vm0, %v185_v8, %v168_v1 }
 0x117   : > { %201 = vrot.lane.b32.xlu1 %v187_v9, %s1184_s12  ;;  %192 = vrot.lane.b32.xlu2 %v187_v9, %s1185_s24 }
 0x169   : > { %v191_v10 = vpop.permute.xlu2 %190 }
 0x16a   : > { %v196_v16 = vsel %vm174_vm1, 0.0, %v191_v10 }
 0x16b   : > { %v211_v21 = vadd.f32 %v209_v15, %v196_v16 }
 0x171   : > { %v193_v14 = vpop.permute.xlu2 %192 }
 0x172   : > { %v197_v20 = vsel %vm174_vm1, 0.0, %v193_v14 }
 0x173   : > { %v212_v23 = vadd.f32 %v210_v17, %v197_v20 }
 0x181   : > { %v200_v13 = vpop.permute.xlu0 %199 }
 0x182   : > { %v205_v18 = vsel %vm198_vm2, 0.0, %v200_v13 }
 0x183   : > { %v207_v22 = vsub.f32 %v196_v16, %v205_v18  ;;  %v213_v25 = vadd.f32 %v211_v21, %v205_v18 }
 0x185   : > { %v217_v30 = vrot.slane %v207_v22, 7  ;;  %v233_v35 = vrot.slane %v213_v25, 7  ;;  %v226_v36 = vrot.slane %v207_v22, 1  ;;  %v239_v37 = vrot.slane %v213_v25, 1 }
 0x186   : > { %v245_v38 = vmul.f32 2.0, %v207_v22 }
 0x189   : > { %v202_v24 = vpop.permute.xlu1 %201 }
 0x18a   : > { %v206_v27 = vsel %vm198_vm2, 0.0, %v202_v24 }
 0x18b   : > { %v208_v28 = vsub.f32 %v197_v20, %v206_v27  ;;  %v214_v29 = vadd.f32 %v212_v23, %v206_v27 }
 0x18d   : > { %v218_v31 = vrot.slane %v208_v28, 7  ;;  %v227_v32 = vrot.slane %v208_v28, 1  ;;  %v234_v33 = vrot.slane %v214_v29, 7  ;;  %v240_v34 = vrot.slane %v214_v29, 1 }
 0x18e   : > { %v246_v43 = vmul.f32 2.0, %v208_v28 }
 0x18f   : > { %v221_v39 = vsel %vm219_vm4, %v218_v31, %v217_v30  ;;  %v220_v40 = vsel %vm219_vm4, %v217_v30, %v218_v31  ;;  %v236_v42 = vsel %vm219_vm4, %v234_v33, %v233_v35  ;;  %v230_v44 = vsel %vm228_vm6, %v227_v32, %v226_v36 }
 0x190   : > { %v222_v41 = vsel %vm215_vm3, 0.0, %v221_v39  ;;  %v237_v45 = vsel %vm215_vm3, 0.0, %v236_v42  ;;  %v241_v46 = vsel %vm228_vm6, %v239_v37, %v240_v34  ;;  %v229_v48 = vsel %vm228_vm6, %v226_v36, %v227_v32 }
 0x191   : > { %v247_v47 = vadd.f32 %v245_v38, %v222_v41  ;;  %v242_v49 = vsel %vm228_vm6, %v240_v34, %v239_v37  ;;  %v1282_v50 = vsub.f32 %v237_v45, %v241_v46  ;;  %v232_v52 = vsel %vm225_vm5, 0.0, %v230_v44 }
 0x192   : > { %v248_v53 = vadd.f32 %v246_v43, %v220_v40  ;;  %v235_v54 = vsel %vm219_vm4, %v233_v35, %v234_v33  ;;  %v244_v55 = vsel %vm225_vm5, 0.0, %v242_v49 }
 0x193   : > { %v1284_v51 = vadd.f32 %v247_v47, %v229_v48  ;;  %v1290_v56 = vand.u32 2147483647, %v1282_v50  ;;  %v1299_v60 = vsub.f32 %v235_v54, %v244_v55  ;;  %vm330_vm7 = vcmp.ne.f32.partialorder %v1282_v50, %v1282_v50 }
 0x194   : > { %v1297_v59 = vadd.f32 %v248_v53, %v232_v52  ;;  %v255_v45 = vmul.f32 %v1282_v50, %v1282_v50 }
 0x195   : > { %v1293_v57 = vand.u32 2147483647, %v1284_v51  ;;  %vm331_vm8 = vcmp.ne.f32.partialorder %v1284_v51, %v1284_v51  ;;  %vm336_vm10 = vcmp.eq.s32.totalorder %v1290_v56, inf  ;;  %v1312_v62 = vand.u32 2147483647, %v1299_v60 }
 0x196   : > { %vm1305_vm9 = vmor %vm330_vm7, %vm331_vm8  ;;  %v1315_v63 = vand.u32 2147483647, %v1297_v59  ;;  %vm390_vm13 = vcmp.ne.f32.partialorder %v1299_v60, %v1299_v60  ;;  %vm391_vm14 = vcmp.ne.f32.partialorder %v1297_v59, %v1297_v59  ;;  %v253_v40 = vmul.f32 %v1284_v51, %v1284_v51 }
 0x197   : > { %v286_v58 = vmax.f32 %v1290_v56, %v1293_v57  ;;  %vm337_vm11 = vcmp.eq.s32.totalorder %v1293_v57, inf  ;;  %vm1327_vm15 = vmor %vm390_vm13, %vm391_vm14  ;;  %vm396_vm0 = vcmp.eq.s32.totalorder %v1312_v62, inf  ;;  %v285_v15 = vmin.f32 %v1290_v56, %v1293_v57 }
 0x198   : > { %vm1317_vm12 = vmand %vm336_vm10, %vm337_vm11  ;;  %v346_v1 = vmax.f32 %v1312_v62, %v1315_v63  ;;  %vm397_vm1 = vcmp.eq.s32.totalorder %v1315_v63, inf  ;;  %v345_v25 = vmin.f32 %v1312_v62, %v1315_v63  ;;  %v254_v42 = vmul.f32 %v1297_v59, %v1297_v59 }
 0x199   : > { %1107 = vrcp.f32 %v286_v58  ;;  %vm1333_vm2 = vmand %vm396_vm0, %vm397_vm1  ;;  %v298_v7 = vand.u32 2147483648, %v286_v58  ;;  %v296_v10 = vand.u32 2147483647, %v286_v58  ;;  %vm292_vm4 = vweird.f32 %v286_v58 }
 0x19a   : > { %1109 = vrcp.f32 %v346_v1  ;;  %v358_v17 = vand.u32 2147483648, %v346_v1  ;;  %v356_v20 = vand.u32 2147483647, %v346_v1  ;;  %vm352_vm8 = vweird.f32 %v346_v1 }
 0x19b   : > { %v299_v13 = vor.u32 1.1754944e-38, %v298_v7  ;;  %vm297_vm6 = vcmp.eq.f32.partialorder %v296_v10, 8.507059e+37  ;;  %v256_v43 = vmul.f32 %v1299_v60, %v1299_v60  ;;  %v1349_v48 = vadd.f32 %v255_v45, %v253_v40 }
 0x19c   : > { %v359_v24 = vor.u32 1.1754944e-38, %v358_v17  ;;  %vm357_vm11 = vcmp.eq.f32.partialorder %v356_v20, 8.507059e+37  ;;  %vm320_vm13 = vcmp.gt.f32.partialorder %v1293_v57, %v1290_v56  ;;  %vm326_vm14 = vcmp.lt.s32.totalorder %v1282_v50, 0 }
 0x19d   : > { %v1351_v52 = vadd.f32 %v256_v43, %v254_v42  ;;  %1111 = vrsqrt.f32 %v1349_v48  ;;  %vm323_vm0 = vcmp.lt.f32.partialorder %v1282_v50, 0.0  ;;  %v1186_v57 = vmov 0.0  }
 0x19e   : > { %vm328_vm1 = vcmp.eq.f32.partialorder %v1284_v51, 0.0  ;;  %v341_v40 = vand.u32 2147483648, %v1284_v51  ;;  %v401_v51 = vand.u32 2147483648, %v1297_v59 }
 0x19f   : > { %v1108_v3 = vpop.eup %1107  ;;  %1113 = vrsqrt.f32 %v1351_v52 }
 0x1a0   : > { %v288_v4 = vmul.f32 %v1108_v3, %v286_v58  ;;  %v1110_v8 = vpop.eup %1109  ;;  %vm293_vm3 = vweird.f32 %v1108_v3 }
 0x1a1   : > { %v348_v11 = vmul.f32 %v1110_v8, %v346_v1  ;;  %vm294_vm5 = vmor %vm292_vm4, %vm293_vm3  ;;  %vm353_vm7 = vweird.f32 %v1110_v8  ;;  %vm380_vm3 = vcmp.gt.f32.partialorder %v1315_v63, %v1312_v62  ;;  %vm386_vm4 = vcmp.lt.s32.totalorder %v1299_v60, 0 }
 0x1a2   : > { %v289_v6 = vsub.f32 1.0, %v288_v4  ;;  %vm354_vm10 = vmor %vm352_vm8, %vm353_vm7  ;;  %v387_v42 = vsel %vm386_vm4, 3.1415927, %v1186_v57  ;;  %vm280_vm7 = vcmp.eq.f32.partialorder %v1351_v52, 0.0 }
 0x1a3   : > { %v349_v14 = vsub.f32 1.0, %v348_v11 }
 0x1a4   : > { %v290_v9 = vmul.f32 %v1108_v3, %v289_v6 }
 0x1a5   : > { %v350_v19 = vmul.f32 %v1110_v8, %v349_v14 }
 0x1a6   : > { %v291_v12 = vadd.f32 %v1108_v3, %v290_v9 }
 0x1a7   : > { %v351_v22 = vadd.f32 %v1110_v8, %v350_v19 }
 0x1a8   : > { %v295_v16 = vsel %vm294_vm5, %v1108_v3, %v291_v12  ;;  %vm388_vm5 = vcmp.eq.f32.partialorder %v1297_v59, 0.0  ;;  %v269_v59 = vand.u32 2147483648, %v1349_v48 }
 0x1a9   : > { %v300_v18 = vsel %vm297_vm6, %v299_v13, %v295_v16  ;;  %v355_v26 = vsel %vm354_vm10, %v1110_v8, %v351_v22  ;;  %v1112_v8 = vpop.eup %1111 }
 0x1aa   : > { %v301_v21 = vmul.f32 %v300_v18, %v285_v15  ;;  %v360_v28 = vsel %vm357_vm11, %v359_v24, %v355_v26  ;;  %v1114_v10 = vpop.eup %1113  ;;  %v260_v14 = vmul.f32 %v1112_v8, %v1349_v48 }
 0x1ab   : > { %v361_v29 = vmul.f32 %v360_v28, %v345_v25  ;;  %v272_v15 = vmul.f32 %v1114_v10, %v1351_v52 }
 0x1ac   : > { %v302_v23 = vmul.f32 %v301_v21, %v301_v21  ;;  %v261_v20 = vmul.f32 %v1112_v8, %v260_v14 }
 0x1ad   : > { %v362_v31 = vmul.f32 %v361_v29, %v361_v29  ;;  %v273_v22 = vmul.f32 %v1114_v10, %v272_v15 }
 0x1ae   : > { %v303_v27 = vmul.f32 0.002785687, %v302_v23 }
 0x1af   : > { %v363_v33 = vmul.f32 0.002785687, %v362_v31 }
 0x1b0   : > { %v304_v30 = vadd.f32 -0.015866, %v303_v27  ;;  %v438_v27 = vld [vmem:[%s1733_s1 + $0x8] sm:$0xff] }
 0x1b1   : > { %v364_v35 = vadd.f32 -0.015866, %v363_v33  ;;  %v327_v33 = vsel %vm326_vm14, 3.1415927, %v1186_v57 }
 0x1b2   : > { %v305_v32 = vmul.f32 %v304_v30, %v302_v23 }
 0x1b3   : > { %v365_v37 = vmul.f32 %v364_v35, %v362_v31 }
 0x1b4   : > { %v306_v34 = vadd.f32 0.04247222, %v305_v32  ;;  %v274_v32 = vmul.f32 0.5, %v273_v22 }
 0x1b5   : > { %v366_v39 = vadd.f32 0.04247222, %v365_v37 }
 0x1b6   : > { %v307_v36 = vmul.f32 %v306_v34, %v302_v23 }
 0x1b7   : > { %v367_v44 = vmul.f32 %v366_v39, %v362_v31  ;;  %v275_v39 = vsub.f32 1.5, %v274_v32 }
 0x1b8   : > { %v308_v38 = vadd.f32 -0.074975304, %v307_v36 }
 0x1b9   : > { %v368_v47 = vadd.f32 -0.074975304, %v367_v44 }
 0x1ba   : > { %v309_v41 = vmul.f32 %v308_v38, %v302_v23 }
 0x1bb   : > { %v369_v53 = vmul.f32 %v368_v47, %v362_v31 }
 0x1bc   : > { %v310_v46 = vadd.f32 0.1064488, %v309_v41 }
 0x1bd   : > { %v370_v55 = vadd.f32 0.1064488, %v369_v53 }
 0x1be   : > { %v311_v49 = vmul.f32 %v310_v46, %v302_v23  ;;  %v276_v46 = vmul.f32 %v1114_v10, %v275_v39 }
 0x1bf   : > { %v371_v1 = vmul.f32 %v370_v55, %v362_v31 }
 0x1c0   : > { %v312_v54 = vadd.f32 -0.14207031, %v311_v49 }
 0x1c1   : > { %v372_v4 = vadd.f32 -0.14207031, %v371_v1 }
 0x1c2   : > { %v313_v58 = vmul.f32 %v312_v54, %v302_v23 }
 0x1c3   : > { %v373_v7 = vmul.f32 %v372_v4, %v362_v31 }
 0x1c4   : > { %v314_v3 = vadd.f32 0.19993454, %v313_v58  ;;  %v277_v58 = vmul.f32 %v276_v46, %v1351_v52 }
 0x1c5   : > { %v374_v11 = vadd.f32 0.19993454, %v373_v7 }
 0x1c6   : > { %v315_v6 = vmul.f32 %v314_v3, %v302_v23 }
 0x1c7   : > { %v375_v13 = vmul.f32 %v374_v11, %v362_v31 }
 0x1c8   : > { %v316_v9 = vadd.f32 -0.33333147, %v315_v6 }
 0x1c9   : > { %v376_v17 = vadd.f32 -0.33333147, %v375_v13 }
 0x1ca   : > { %v317_v12 = vmul.f32 %v316_v9, %v302_v23  ;;  %v437_v23 = vld [vmem:[%s1733_s1] sm:$0xff] }
 0x1cb   : > { %v377_v19 = vmul.f32 %v376_v17, %v362_v31  ;;  %v1366_v30 = vpack.c.bf16 %v438_v27, %v437_v23  ;;  %v262_v31 = vmul.f32 0.5, %v261_v20 }
 0x1cc   : > { %v318_v16 = vmul.f32 %v317_v12, %v301_v21 }
 0x1cd   : > { %v378_v25 = vmul.f32 %v377_v19, %v361_v29  ;;  %472 = vmatpush.bf16.msra.mxu0 %v1366_v30  ;;  %519 = vmatpush.bf16.msra.mxu1 %v1366_v30  ;;  %v263_v38 = vsub.f32 1.5, %v262_v31 }
 0x1ce   : > { %v319_v18 = vadd.f32 %v318_v16, %v301_v21  ;;  %565 = vmatpush.bf16.msra.mxu2 %v1366_v30  ;;  %611 = vmatpush.bf16.msra.mxu3 %v1366_v30 }
 0x1cf   : > { %v379_v28 = vadd.f32 %v378_v25, %v361_v29  ;;  %v1187_v29 = vmov 0.7853982   ;;  %v264_v45 = vmul.f32 %v1112_v8, %v263_v38  ;;  %v281_v8 = vand.u32 2147483648, %v1351_v52 }
 0x1d0   : > { %v321_v24 = vsub.f32 1.5707964, %v319_v18  ;;  %v335_v36 = vsel %vm323_vm0, 2.3561945, %v1187_v29 }
 0x1d1   : > { %v381_v34 = vsub.f32 1.5707964, %v379_v28  ;;  %703 = vmatpush.bf16.msrb.mxu1 %v1366_v30  ;;  %657 = vmatpush.bf16.msrb.mxu0 %v1366_v30  ;;  %v265_v55 = vmul.f32 %v264_v45, %v1349_v48 }
 0x1d2   : > { %v322_v26 = vsel %vm320_vm13, %v321_v24, %v319_v18  ;;  %749 = vmatpush.bf16.msrb.mxu2 %v1366_v30  ;;  %795 = vmatpush.bf16.msrb.mxu3 %v1366_v30 }
 0x1d3   : > { %v324_v21 = vsub.f32 3.1415927, %v322_v26  ;;  %v382_v37 = vsel %vm380_vm3, %v381_v34, %v379_v28 }
 0x1d4   : > { %v384_v63 = vsub.f32 3.1415927, %v382_v37 }
 0x1d5   : > { %v325_v56 = vsel %vm323_vm0, %v324_v21, %v322_v26 }
 0x1d6   : > { %v329_v35 = vsel %vm328_vm1, %v327_v33, %v325_v56 }
 0x1d7   : > { %v333_v50 = vsel %vm1305_vm9, nan, %v329_v35  ;;  %vm383_vm9 = vcmp.lt.f32.partialorder %v1299_v60, 0.0 }
 0x1d8   : > { %v339_v62 = vsel %vm1317_vm12, %v335_v36, %v333_v50  ;;  %v385_v41 = vsel %vm383_vm9, %v384_v63, %v382_v37  ;;  %v395_v47 = vsel %vm383_vm9, 2.3561945, %v1187_v29  ;;  %vm266_vm12 = vcmp.eq.f32.partialorder %v1349_v48, inf }
 0x1d9   : > { %v340_v61 = vand.u32 2147483647, %v339_v62  ;;  %v389_v44 = vsel %vm388_vm5, %v387_v42, %v385_v41  ;;  %v267_v5 = vsel %vm266_vm12, %v1349_v48, %v265_v55 }
 0x1da   : > { %v393_v0 = vsel %vm1327_vm15, nan, %v389_v44  ;;  %vm278_vm15 = vcmp.eq.f32.partialorder %v1351_v52, inf }
 0x1db   : > { %v342_v43 = vor.u32 %v341_v40, %v340_v61  ;;  %v399_v49 = vsel %vm1333_vm2, %v395_v47, %v393_v0  ;;  %v279_v6 = vsel %vm278_vm15, %v1351_v52, %v277_v58  ;;  %vm268_vm2 = vcmp.eq.f32.partialorder %v1349_v48, 0.0 }
 0x1dc   : > { %v400_v54 = vand.u32 2147483647, %v399_v49  ;;  %v270_v12 = vsel %vm268_vm2, %v269_v59, %v267_v5  ;;  %v282_v13 = vsel %vm280_vm7, %v281_v8, %v279_v6  ;;  %vm461_vm2 = vcmask 130048  }
 0x1dd   : > { %v403_v53 = vmul.f32 3.1830988, %v342_v43  ;;  %v427_v18 = vsub.f32 1.0, %v270_v12  ;;  %v428_v19 = vsub.f32 1.0, %v282_v13 }
 0x1de   : > { %v402_v1 = vor.u32 %v401_v51, %v400_v54 }
 0x1df   : > { %v405_v60 = vfloor.f32 %v403_v53 }
 0x1e0   : > { %v404_v4 = vmul.f32 3.1830988, %v402_v1 }
 0x1e1   : > { %v1058_v3 = vcvt.f32.s32 %v405_v60  ;;  %vm407_vm10 = vcmp.eq.f32.partialorder %v403_v53, %v405_v60 }
 0x1e2   : > { %v406_v7 = vfloor.f32 %v404_v4  ;;  %v423_v20 = vsel %vm407_vm10, 1.0, %v270_v12  ;;  %v429_v24 = vsel %vm407_vm10, 0.0, %v427_v18 }
 0x1e3   : > { %vm411_vm6 = vcmp.lt.s32.totalorder %v1058_v3, 0  ;;  %v413_v2 = vadd.s32 10, %v1058_v3  ;;  %v1405_v27 = vpack.c.bf16 %v423_v20, %v423_v20  ;;  %v1407_v28 = vpack.c.bf16 %v429_v24, %v429_v24 }
 0x1e4   : > { %v1060_v10 = vcvt.f32.s32 %v406_v7  ;;  %vm408_vm13 = vcmp.eq.f32.partialorder %v404_v4, %v406_v7 }
 0x1e5   : > { %v415_v9 = vsel %vm411_vm6, %v413_v2, %v1058_v3  ;;  %v424_v25 = vsel %vm408_vm13, 1.0, %v282_v13  ;;  %v430_v26 = vsel %vm408_vm13, 0.0, %v428_v19 }
 0x1e6   : > { %vm417_vm8 = vcmp.ge.s32.totalorder %v415_v9, 10  ;;  %v1041_v11 = vadd.s32 4294967286, %v415_v9  ;;  %vm412_vm11 = vcmp.lt.s32.totalorder %v1060_v10, 0  ;;  %v414_v14 = vadd.s32 10, %v1060_v10 }
 0x1e7   : > { %v1412_v31 = vpack.c.bf16 %v424_v25, %v424_v25  ;;  %v1414_v32 = vpack.c.bf16 %v430_v26, %v430_v26 }
 0x1e8   : > { %v421_v15 = vsel %vm417_vm8, %v1041_v11, %v415_v9  ;;  %v416_v17 = vsel %vm412_vm11, %v414_v14, %v1060_v10 }
 0x1e9   : > { %v433_v16 = vcvt.s32.f32 %v421_v15  ;;  %vm418_vm14 = vcmp.ge.s32.totalorder %v416_v17, 10  ;;  %v1042_v48 = vadd.s32 4294967286, %v416_v17 }
 0x1eb   : > { %v435_v22 = vpack.c.bf16 %v433_v16, %v433_v16  ;;  %v422_v52 = vsel %vm418_vm14, %v1042_v48, %v416_v17 }
 0x1ec   : > { %v434_v21 = vcvt.s32.f32 %v422_v52 }
 0x1ed   : > { %v1403_v23 = vunpack.c.l.bf16 %v435_v22 }
 0x1ee   : > { %v436_v56 = vpack.c.bf16 %v434_v21, %v434_v21 }
 0x1ef   : > { %vm442_vm0 = vcmp.eq.f32.partialorder %v1403_v23, 0.0  ;;  %vm444_vm1 = vcmp.eq.f32.partialorder %v1403_v23, 1.0  ;;  %vm816_vm3 = vcmp.eq.f32.partialorder %v1403_v23, 9.0  ;;  %vm494_vm9 = vcmp.eq.f32.partialorder %v1403_v23, 2.0 }
 0x1f0   : > { %vm1416_vm4 = vmpackc.low %vm444_vm1, %vm444_vm1  ;;  %vm540_vm12 = vcmp.eq.f32.partialorder %v1403_v23, 3.0  ;;  %vm586_vm15 = vcmp.eq.f32.partialorder %v1403_v23, 4.0  ;;  %v1429_v35 = vunpack.c.l.bf16 %v436_v56  ;;  %vm632_vm8 = vcmp.eq.f32.partialorder %v1403_v23, 5.0 }
 0x1f1   : > { %v448_v33 = vsel %vm1416_vm4, %v1405_v27, 0  ;;  %vm450_vm5 = vmpackc.low %vm442_vm0, %vm442_vm0  ;;  %v500_v34 = vsel %vm1416_vm4, %v1407_v28, 0  ;;  %vm678_vm0 = vcmp.eq.f32.partialorder %v1403_v23, 6.0 }
 0x1f2   : > { %v452_v50 = vsel %vm450_vm5, %v1407_v28, 0  ;;  %v454_v29 = vunpack.c.l.bf16 %v448_v33  ;;  %vm1432_vm6 = vmpackc.low %vm816_vm3, %vm816_vm3  ;;  %v862_v37 = vsel %vm450_vm5, %v1405_v27, 0  ;;  %v504_v61 = vunpack.c.l.bf16 %v500_v34 }
 0x1f3   : > { %v456_v38 = vunpack.c.l.bf16 %v452_v50  ;;  %v864_v39 = vsel %vm1432_vm6, %v1407_v28, 0  ;;  %v866_v62 = vunpack.c.l.bf16 %v862_v37  ;;  %vm1440_vm7 = vmpackc.low %vm494_vm9, %vm494_vm9  ;;  %vm443_vm10 = vcmp.eq.f32.partialorder %v1429_v35, 0.0 }
 0x1f4   : > { %vm445_vm11 = vcmp.eq.f32.partialorder %v1429_v35, 1.0  ;;  %vm817_vm13 = vcmp.eq.f32.partialorder %v1429_v35, 9.0  ;;  %v868_v40 = vunpack.c.l.bf16 %v864_v39  ;;  %vm1451_vm14 = vmpackc.low %vm540_vm12, %vm540_vm12  ;;  %vm495_vm3 = vcmp.eq.f32.partialorder %v1429_v35, 2.0 }
 0x1f5   : > { %vm447_vm1 = vmpackc.low %vm445_vm11, %vm445_vm11  ;;  %v458_v42 = vadd.f32 %v456_v38, %v454_v29  ;;  %v498_v43 = vsel %vm1440_vm7, %v1405_v27, 0  ;;  %vm541_vm4 = vcmp.eq.f32.partialorder %v1429_v35, 3.0  ;;  %vm724_vm12 = vcmp.eq.f32.partialorder %v1403_v23, 7.0 }
 0x1f6   : > { %v449_v44 = vsel %vm447_vm1, %v1412_v31, 0  ;;  %vm451_vm9 = vmpackc.low %vm443_vm10, %vm443_vm10  ;;  %v1462_v45 = vadd.f32 %v868_v40, %v866_v62  ;;  %v501_v46 = vsel %vm447_vm1, %v1414_v32, 0  ;;  %v502_v0 = vunpack.c.l.bf16 %v498_v43 }
 0x1f7   : > { %v453_v47 = vsel %vm451_vm9, %v1414_v32, 0  ;;  %v455_v49 = vunpack.c.l.bf16 %v449_v44  ;;  %vm1469_vm5 = vmpackc.low %vm817_vm13, %vm817_vm13  ;;  %v863_v54 = vsel %vm451_vm9, %v1412_v31, 0  ;;  %v505_v51 = vunpack.c.l.bf16 %v501_v46 }
 0x1f8   : > { %v457_v60 = vunpack.c.l.bf16 %v453_v47  ;;  %v865_v55 = vsel %vm1469_vm5, %v1414_v32, 0  ;;  %v867_v58 = vunpack.c.l.bf16 %v863_v54  ;;  %vm1481_vm10 = vmpackc.low %vm495_vm3, %vm495_vm3  ;;  %v506_v3 = vadd.f32 %v504_v61, %v502_v0 }
 0x1f9   : > { %v869_v4 = vunpack.c.l.bf16 %v865_v55  ;;  %v499_v2 = vsel %vm1481_vm10, %v1412_v31, 0  ;;  %vm1491_vm11 = vmpackc.low %vm541_vm4, %vm541_vm4  ;;  %v544_v6 = vsel %vm1451_vm14, %v1405_v27, 0  ;;  %v546_v7 = vsel %vm1440_vm7, %v1407_v28, 0 }
 0x1fa   : > { %v459_v59 = vadd.f32 %v457_v60, %v455_v49  ;;  %v503_v8 = vunpack.c.l.bf16 %v499_v2  ;;  %v545_v9 = vsel %vm1491_vm11, %v1412_v31, 0  ;;  %v547_v10 = vsel %vm1481_vm10, %v1414_v32, 0  ;;  %vm1510_vm13 = vmpackc.low %vm586_vm15, %vm586_vm15 }
 0x1fb   : > { %v1514_v12 = vadd.f32 %v869_v4, %v867_v58  ;;  %v548_v13 = vunpack.c.l.bf16 %v544_v6  ;;  %v549_v14 = vunpack.c.l.bf16 %v545_v9  ;;  %v550_v15 = vunpack.c.l.bf16 %v546_v7  ;;  %vm1537_vm15 = vmpackc.low %vm632_vm8, %vm632_vm8 }
 0x1fc   : > { %v460_v16 = vpack.c.bf16 %v459_v59, %v458_v42  ;;  %v507_v17 = vadd.f32 %v505_v51, %v503_v8  ;;  %v551_v18 = vunpack.c.l.bf16 %v547_v10  ;;  %vm587_vm7 = vcmp.eq.f32.partialorder %v1429_v35, 4.0  ;;  %vm1576_vm4 = vmpackc.low %vm724_vm12, %vm724_vm12 }
 0x1fd   : > { %v552_v19 = vadd.f32 %v550_v15, %v548_v13  ;;  %vm1517_vm1 = vmpackc.low %vm587_vm7, %vm587_vm7  ;;  %v590_v20 = vsel %vm1510_vm13, %v1405_v27, 0  ;;  %v592_v22 = vsel %vm1451_vm14, %v1407_v28, 0  ;;  %v593_v24 = vsel %vm1491_vm11, %v1414_v32, 0 }
 0x1fe   : > { %1043 = vmatmul.msk.bf16.vlgmr.msra.gmra.mxu0 %vm461_vm2, %v460_v16  ;;  %v508_v52 = vpack.c.bf16 %v507_v17, %v506_v3  ;;  %v553_v25 = vadd.f32 %v551_v18, %v549_v14  ;;  %v591_v26 = vsel %vm1517_vm1, %v1412_v31, 0  ;;  %v594_v21 = vunpack.c.l.bf16 %v590_v20  ;;  %vm1547_vm14 = vmpackc.low %vm678_vm0, %vm678_vm0 }
 0x1ff   : > { %v595_v57 = vunpack.c.l.bf16 %v591_v26  ;;  %v596_v33 = vunpack.c.l.bf16 %v592_v22  ;;  %v597_v34 = vunpack.c.l.bf16 %v593_v24  ;;  %v638_v50 = vsel %vm1510_vm13, %v1407_v28, 0  ;;  %841 = vmatpush.bf16.msra.mxu0 %v1366_v30 }
 0x200   : > { %1044 = vmatmul.msk.bf16.vlgmr.msra.gmra.mxu1 %vm461_vm2, %v508_v52  ;;  %v554_v37 = vpack.c.bf16 %v553_v25, %v552_v19  ;;  %v639_v38 = vsel %vm1517_vm1, %v1414_v32, 0  ;;  %v642_v39 = vunpack.c.l.bf16 %v638_v50  ;;  %vm633_vm8 = vcmp.eq.f32.partialorder %v1429_v35, 5.0 }
 0x201   : > { %v598_v62 = vadd.f32 %v596_v33, %v594_v21  ;;  %v599_v63 = vadd.f32 %v597_v34, %v595_v57  ;;  %v643_v61 = vunpack.c.l.bf16 %v639_v38  ;;  %vm1557_vm3 = vmpackc.low %vm633_vm8, %vm633_vm8  ;;  %v636_v41 = vsel %vm1537_vm15, %v1405_v27, 0  ;;  %883 = vmatpush.bf16.msra.mxu1 %v1366_v30 }
 0x202   : > { %1045 = vmatmul.msk.bf16.vlgmr.msra.gmra.mxu2 %vm461_vm2, %v554_v37  ;;  %v637_v42 = vsel %vm1557_vm3, %v1412_v31, 0  ;;  %v640_v43 = vunpack.c.l.bf16 %v636_v41  ;;  %vm679_vm0 = vcmp.eq.f32.partialorder %v1429_v35, 6.0  ;;  %v682_v44 = vsel %vm1547_vm14, %v1405_v27, 0 }
 0x203   : > { %v600_v30 = vpack.c.bf16 %v599_v63, %v598_v62  ;;  %v641_v0 = vunpack.c.l.bf16 %v637_v42  ;;  %vm1580_vm9 = vmpackc.low %vm679_vm0, %vm679_vm0  ;;  %v684_v49 = vsel %vm1537_vm15, %v1407_v28, 0  ;;  %v685_v54 = vsel %vm1557_vm3, %v1414_v32, 0 }
 0x204   : > { %v644_v51 = vadd.f32 %v642_v39, %v640_v43  ;;  %v683_v60 = vsel %vm1580_vm9, %v1412_v31, 0  ;;  %v686_v55 = vunpack.c.l.bf16 %v682_v44  ;;  %v688_v58 = vunpack.c.l.bf16 %v684_v49 }
 0x205   : > { %1046 = vmatmul.msk.bf16.vlgmr.msra.gmra.mxu3 %vm461_vm2, %v600_v30  ;;  %v645_v1 = vadd.f32 %v643_v61, %v641_v0  ;;  %v687_v3 = vunpack.c.l.bf16 %v683_v60  ;;  %v689_v4 = vunpack.c.l.bf16 %v685_v54  ;;  %vm725_vm12 = vcmp.eq.f32.partialorder %v1429_v35, 7.0 }
 0x206   : > { %v690_v2 = vadd.f32 %v688_v58, %v686_v55  ;;  %vm1595_vm10 = vmpackc.low %vm725_vm12, %vm725_vm12  ;;  %v728_v6 = vsel %vm1576_vm4, %v1405_v27, 0  ;;  %v730_v7 = vsel %vm1547_vm14, %v1407_v28, 0  ;;  %v731_v59 = vsel %vm1580_vm9, %v1414_v32, 0 }
 0x207   : > { %v646_v8 = vpack.c.bf16 %v645_v1, %v644_v51  ;;  %v691_v9 = vadd.f32 %v689_v4, %v687_v3  ;;  %v729_v10 = vsel %vm1595_vm10, %v1412_v31, 0  ;;  %v732_v11 = vunpack.c.l.bf16 %v728_v6 }
 0x208   : > { %v733_v13 = vunpack.c.l.bf16 %v729_v10  ;;  %v734_v14 = vunpack.c.l.bf16 %v730_v7  ;;  %v735_v15 = vunpack.c.l.bf16 %v731_v59  ;;  %vm770_vm11 = vcmp.eq.f32.partialorder %v1403_v23, 8.0 }
 0x209   : > { %v692_v16 = vpack.c.bf16 %v691_v9, %v690_v2  ;;  %vm771_vm13 = vcmp.eq.f32.partialorder %v1429_v35, 8.0  ;;  %vm772_vm7 = vmpackc.low %vm770_vm11, %vm770_vm11  ;;  %v776_v17 = vsel %vm1576_vm4, %v1407_v28, 0  ;;  %v777_v18 = vsel %vm1595_vm10, %v1414_v32, 0 }
 0x20a   : > { %v736_v19 = vadd.f32 %v734_v14, %v732_v11  ;;  %v737_v48 = vadd.f32 %v735_v15, %v733_v13  ;;  %vm773_vm1 = vmpackc.low %vm771_vm13, %vm771_vm13  ;;  %v774_v20 = vsel %vm772_vm7, %v1405_v27, 0  ;;  %v780_v22 = vunpack.c.l.bf16 %v776_v17 }
 0x20b   : > { %v775_v23 = vsel %vm773_vm1, %v1412_v31, 0  ;;  %v778_v24 = vunpack.c.l.bf16 %v774_v20  ;;  %v781_v52 = vunpack.c.l.bf16 %v777_v18  ;;  %v822_v35 = vsel %vm772_vm7, %v1407_v28, 0 }
 0x20c   : > { %v738_v25 = vpack.c.bf16 %v737_v48, %v736_v19  ;;  %v779_v26 = vunpack.c.l.bf16 %v775_v23  ;;  %v823_v21 = vsel %vm773_vm1, %v1414_v32, 0  ;;  %v826_v56 = vunpack.c.l.bf16 %v822_v35 }
 0x20d   : > { %v782_v57 = vadd.f32 %v780_v22, %v778_v24  ;;  %v827_v33 = vunpack.c.l.bf16 %v823_v21  ;;  %v820_v34 = vsel %vm1432_vm6, %v1405_v27, 0  ;;  %v821_v50 = vsel %vm1469_vm5, %v1412_v31, 0 }
 0x20e   : > { %1047 = vmatmul.msk.bf16.vlgmr.msrb.gmra.mxu0 %vm461_vm2, %v646_v8  ;;  %v783_v29 = vadd.f32 %v781_v52, %v779_v26  ;;  %v824_v37 = vunpack.c.l.bf16 %v820_v34  ;;  %v825_v28 = vunpack.c.l.bf16 %v821_v50  ;;  %v872_v38 = vpack.c.bf16 %v1514_v12, %v1462_v45 }
 0x20f   : > { %vm479_vm6 = vcmask 15360   ;;  %vm906_vm5 = vcmask 1041409   ;;  %vm948_vm15 = vcmask 1041408   ;;  %vm916_vm14 = vcmask 1045509  }
 0x210   : > { %1048 = vmatmul.msk.bf16.vlgmr.msrb.gmra.mxu1 %vm461_vm2, %v692_v16  ;;  %v784_v32 = vpack.c.bf16 %v783_v29, %v782_v57  ;;  %v828_v39 = vadd.f32 %v826_v56, %v824_v37  ;;  %v829_v62 = vadd.f32 %v827_v33, %v825_v28  ;;  %vm950_vm8 = vcmask 1043456  }
 0x211   : > { %vm952_vm3 = vcmask 1045504   ;;  %vm921_vm0 = vcmask 1047559   ;;  %vm963_vm4 = vcmask 11264  }
 0x212   : > { %1049 = vmatmul.msk.bf16.vlgmr.msrb.gmra.mxu2 %vm461_vm2, %v738_v25  ;;  %v830_v27 = vpack.c.bf16 %v829_v62, %v828_v39 }
 0x215   : > { %1050 = vmatmul.msk.bf16.vlgmr.msrb.gmra.mxu3 %vm461_vm2, %v784_v32 }
 0x21e   : > { %1051 = vmatmul.msk.bf16.vlgmr.msra.gmra.mxu0 %vm461_vm2, %v830_v27 }
 0x220   : > { %1052 = vmatmul.msk.bf16.vlgmr.msra.gmra.mxu1 %vm461_vm2, %v872_v38  ;;  %vm911_vm2 = vcmask 1043459  }
 0x27b   : > { %v474_v31 = vpop.f32.mrf.mxu0 }
 0x27c   : > { %v480_v53 = vsel %vm479_vm6, %v474_v31, 0.0 }
 0x27d   : > { %v521_v36 = vpop.f32.mrf.mxu1  ;;  %v481_v45 = vrot.slane %v480_v53, 4 }
 0x27e   : > { %v526_v41 = vsel %vm479_vm6, %v521_v36, 0.0 }
 0x27f   : > { %v482_v40 = vadd.f32 %v481_v45, %v480_v53  ;;  %v527_v44 = vrot.slane %v526_v41, 4 }
 0x281   : > { %v483_v46 = vrot.slane %v482_v40, 2  ;;  %v528_v58 = vadd.f32 %v527_v44, %v526_v41 }
 0x283   : > { %v476_v12 = vpop.f32.mrf.mxu0  ;;  %v1645_v5 = vadd.f32 %v483_v46, %v482_v40  ;;  %v529_v11 = vrot.slane %v528_v58, 2 }
 0x284   : > { %v487_v49 = vsel %vm479_vm6, %v476_v12, 0.0 }
 0x285   : > { %v567_v63 = vpop.f32.mrf.mxu2  ;;  %v523_v61 = vpop.f32.mrf.mxu1  ;;  %v488_v2 = vrot.slane %v487_v49, 4  ;;  %v485_v18 = vrot.slane %v1645_v5, 1  ;;  %v1651_v26 = vadd.f32 %v529_v11, %v528_v58 }
 0x286   : > { %v572_v0 = vsel %vm479_vm6, %v567_v63, 0.0  ;;  %v533_v1 = vsel %vm479_vm6, %v523_v61, 0.0 }
 0x287   : > { %v573_v4 = vrot.slane %v572_v0, 4  ;;  %v534_v8 = vrot.slane %v533_v1, 4  ;;  %v489_v16 = vadd.f32 %v488_v2, %v487_v49  ;;  %v531_v61 = vrot.slane %v1651_v26, 1 }
 0x288   : > { %v613_v42 = vpop.f32.mrf.mxu3 }
 0x289   : > { %v618_v43 = vsel %vm479_vm6, %v613_v42, 0.0  ;;  %v574_v15 = vadd.f32 %v573_v4, %v572_v0  ;;  %v535_v22 = vadd.f32 %v534_v8, %v533_v1  ;;  %v490_v34 = vrot.slane %v489_v16, 2 }
 0x28a   : > { %v619_v47 = vrot.slane %v618_v43, 4 }
 0x28b   : > { %v659_v30 = vpop.f32.mrf.mxu0  ;;  %v575_v33 = vrot.slane %v574_v15, 2  ;;  %v536_v62 = vrot.slane %v535_v22, 2  ;;  %v1659_v41 = vadd.f32 %v490_v34, %v489_v16 }
 0x28c   : > { %v664_v54 = vsel %vm479_vm6, %v659_v30, 0.0  ;;  %v620_v6 = vadd.f32 %v619_v47, %v618_v43 }
 0x28d   : > { %v569_v51 = vpop.f32.mrf.mxu2  ;;  %v665_v60 = vrot.slane %v664_v54, 4  ;;  %v705_v55 = vpop.f32.mrf.mxu1  ;;  %v1657_v40 = vadd.f32 %v575_v33, %v574_v15  ;;  %v1661_v47 = vadd.f32 %v536_v62, %v535_v22 }
 0x28e   : > { %v710_v3 = vsel %vm479_vm6, %v705_v55, 0.0  ;;  %v579_v13 = vsel %vm479_vm6, %v569_v51, 0.0  ;;  %v621_v19 = vrot.slane %v620_v6, 2 }
 0x28f   : > { %v711_v59 = vrot.slane %v710_v3, 4  ;;  %v666_v10 = vadd.f32 %v665_v60, %v664_v54  ;;  %v580_v23 = vrot.slane %v579_v13, 4 }
 0x290   : > { %v615_v7 = vpop.f32.mrf.mxu3  ;;  %v622_v37 = vadd.f32 %v621_v19, %v620_v6 }
 0x291   : > { %v625_v9 = vsel %vm479_vm6, %v615_v7, 0.0  ;;  %v712_v20 = vadd.f32 %v711_v59, %v710_v3  ;;  %v667_v24 = vrot.slane %v666_v10, 2  ;;  %v581_v27 = vadd.f32 %v580_v23, %v579_v13 }
 0x292   : > { %v626_v14 = vrot.slane %v625_v9, 4  ;;  %v623_v44 = vrot.slane %v622_v37, 1 }
 0x293   : > { %v661_v17 = vpop.f32.mrf.mxu0  ;;  %v713_v28 = vrot.slane %v712_v20, 2  ;;  %v668_v31 = vadd.f32 %v667_v24, %v666_v10  ;;  %v582_v49 = vrot.slane %v581_v27, 2 }
 0x294   : > { %v627_v48 = vadd.f32 %v626_v14, %v625_v9  ;;  %v671_v35 = vsel %vm479_vm6, %v661_v17, 0.0  ;;  %v624_v8 = vadd.f32 %v623_v44, %v622_v37 }
 0x295   : > { %v751_v52 = vpop.f32.mrf.mxu2  ;;  %v707_v25 = vpop.f32.mrf.mxu1  ;;  %v672_v57 = vrot.slane %v671_v35, 4  ;;  %v714_v46 = vadd.f32 %v713_v28, %v712_v20  ;;  %v669_v54 = vrot.slane %v668_v31, 1  ;;  %v1668_v19 = vadd.f32 %v582_v49, %v581_v27 }
 0x296   : > { %v628_v21 = vrot.slane %v627_v48, 2  ;;  %v756_v56 = vsel %vm479_vm6, %v751_v52, 0.0  ;;  %v717_v29 = vsel %vm479_vm6, %v707_v25, 0.0 }
 0x297   : > { %v757_v50 = vrot.slane %v756_v56, 4  ;;  %v673_v32 = vadd.f32 %v672_v57, %v671_v35  ;;  %v718_v39 = vrot.slane %v717_v29, 4  ;;  %v715_v9 = vrot.slane %v714_v46, 1 }
 0x298   : > { %v797_v38 = vpop.f32.mrf.mxu3  ;;  %v629_v53 = vadd.f32 %v628_v21, %v627_v48  ;;  %v670_v48 = vadd.f32 %v669_v54, %v668_v31 }
 0x299   : > { %v802_v36 = vsel %vm479_vm6, %v797_v38, 0.0  ;;  %v758_v45 = vadd.f32 %v757_v50, %v756_v56  ;;  %v674_v12 = vrot.slane %v673_v32, 2  ;;  %v719_v63 = vadd.f32 %v718_v39, %v717_v29 }
 0x29a   : > { %v803_v42 = vrot.slane %v802_v36, 4  ;;  %v630_v58 = vrot.slane %v629_v53, 1  ;;  %v716_v21 = vadd.f32 %v715_v9, %v714_v46 }
 0x29b   : > { %v843_v43 = vpop.f32.mrf.mxu0  ;;  %v675_v30 = vadd.f32 %v674_v12, %v673_v32  ;;  %v720_v0 = vrot.slane %v719_v63, 2  ;;  %v759_v1 = vrot.slane %v758_v45, 2 }
 0x29c   : > { %v848_v60 = vsel %vm479_vm6, %v843_v43, 0.0  ;;  %v804_v2 = vadd.f32 %v803_v42, %v802_v36  ;;  %v631_v23 = vadd.f32 %v630_v58, %v629_v53 }
 0x29d   : > { %v753_v51 = vpop.f32.mrf.mxu2  ;;  %v885_v55 = vpop.f32.mrf.mxu1  ;;  %v676_v3 = vrot.slane %v675_v30, 1  ;;  %v721_v4 = vadd.f32 %v720_v0, %v719_v63  ;;  %v849_v7 = vrot.slane %v848_v60, 4  ;;  %v760_v20 = vadd.f32 %v759_v1, %v758_v45 }
 0x29e   : > { %v763_v6 = vsel %vm479_vm6, %v753_v51, 0.0  ;;  %v890_v59 = vsel %vm479_vm6, %v885_v55, 0.0  ;;  %v805_v24 = vrot.slane %v804_v2, 2  ;;  %v926_v27 = vsel %vm906_vm5, %v631_v23, %v624_v8 }
 0x29f   : > { %v677_v10 = vadd.f32 %v676_v3, %v675_v30  ;;  %v764_v11 = vrot.slane %v763_v6, 4  ;;  %v722_v14 = vrot.slane %v721_v4, 1  ;;  %v850_v16 = vadd.f32 %v849_v7, %v848_v60 }
 0x2a0   : > { %v799_v13 = vpop.f32.mrf.mxu3  ;;  %v891_v17 = vrot.slane %v890_v59, 4  ;;  %v761_v38 = vrot.slane %v760_v20, 1  ;;  %v806_v31 = vadd.f32 %v805_v24, %v804_v2  ;;  %v492_v0 = vrot.slane %v1659_v41, 1 }
 0x2a1   : > { %v809_v15 = vsel %vm479_vm6, %v799_v13, 0.0  ;;  %v765_v22 = vadd.f32 %v764_v11, %v763_v6  ;;  %v851_v57 = vrot.slane %v850_v16, 2  ;;  %v930_v34 = vsel %vm911_vm2, %v677_v10, %v670_v48 }
 0x2a2   : > { %v810_v52 = vrot.slane %v809_v15, 4  ;;  %v892_v35 = vadd.f32 %v891_v17, %v890_v59  ;;  %v723_v50 = vadd.f32 %v722_v14, %v721_v4  ;;  %v954_v45 = vsel %vm948_vm15, %v926_v27, %v930_v34 }
 0x2a3   : > { %v845_v25 = vpop.f32.mrf.mxu0  ;;  %v766_v56 = vrot.slane %v765_v22, 2  ;;  %v852_v63 = vadd.f32 %v851_v57, %v850_v16  ;;  %v762_v49 = vadd.f32 %v761_v38, %v760_v20  ;;  %v538_v60 = vrot.slane %v1661_v47, 1 }
 0x2a4   : > { %v855_v33 = vsel %vm479_vm6, %v845_v25, 0.0  ;;  %v811_v29 = vadd.f32 %v810_v52, %v809_v15  ;;  %v893_v37 = vrot.slane %v892_v35, 2  ;;  %v934_v43 = vsel %vm916_vm14, %v723_v50, %v716_v21 }
 0x2a5   : > { %v887_v28 = vpop.f32.mrf.mxu1  ;;  %v767_v32 = vadd.f32 %v766_v56, %v765_v22  ;;  %v856_v39 = vrot.slane %v855_v33, 4  ;;  %v807_v55 = vrot.slane %v806_v31, 1  ;;  %v955_v3 = vsel %vm950_vm8, %v954_v45, %v934_v43 }
 0x2a6   : > { %v897_v62 = vsel %vm479_vm6, %v887_v28, 0.0  ;;  %v812_v36 = vrot.slane %v811_v29, 2  ;;  %v894_v46 = vadd.f32 %v893_v37, %v892_v35  ;;  %v853_v2 = vrot.slane %v852_v63, 1 }
 0x2a7   : > { %v898_v53 = vrot.slane %v897_v62, 4  ;;  %v768_v12 = vrot.slane %v767_v32, 1  ;;  %v857_v42 = vadd.f32 %v856_v39, %v855_v33  ;;  %v584_v7 = vrot.slane %v1668_v19, 1 }
 0x2a8   : > { %v813_v44 = vadd.f32 %v812_v36, %v811_v29  ;;  %v895_v8 = vrot.slane %v894_v46, 1  ;;  %v577_v10 = vrot.slane %v1657_v40, 1  ;;  %v493_v15 = vadd.f32 %v492_v0, %v1659_v41 }
 0x2a9   : > { %v899_v30 = vadd.f32 %v898_v53, %v897_v62  ;;  %v769_v54 = vadd.f32 %v768_v12, %v767_v32  ;;  %v858_v51 = vrot.slane %v857_v42, 2  ;;  %v539_v17 = vadd.f32 %v538_v60, %v1661_v47 }
 0x2aa   : > { %v814_v58 = vrot.slane %v813_v44, 1  ;;  %v808_v48 = vadd.f32 %v807_v55, %v806_v31  ;;  %v854_v20 = vadd.f32 %v853_v2, %v852_v63  ;;  %v486_v23 = vadd.f32 %v485_v18, %v1645_v5 }
 0x2ab   : > { %v900_v1 = vrot.slane %v899_v30, 2  ;;  %v938_v4 = vsel %vm921_vm0, %v769_v54, %v762_v49  ;;  %v859_v6 = vadd.f32 %v858_v51, %v857_v42  ;;  %v585_v24 = vadd.f32 %v584_v7, %v1668_v19 }
 0x2ac   : > { %v956_v59 = vsel %vm952_vm3, %v955_v3, %v938_v4  ;;  %v815_v13 = vadd.f32 %v814_v58, %v813_v44  ;;  %v896_v52 = vadd.f32 %v895_v8, %v894_v46  ;;  %v532_v41 = vadd.f32 %v531_v61, %v1651_v26 }
 0x2ad   : > { %v901_v9 = vadd.f32 %v900_v1, %v899_v30  ;;  %v959_v11 = vmul.f32 0.015625, %v956_v59  ;;  %v860_v14 = vrot.slane %v859_v6, 1  ;;  %v578_v47 = vadd.f32 %v577_v10, %v1657_v40 }
 0x2ae   : > { %v942_v25 = vsel %vm906_vm5, %v815_v13, %v808_v48  ;;  %v912_v56 = vsel %vm911_vm2, %v493_v15, %v486_v23  ;;  %v917_v19 = vsel %vm916_vm14, %v539_v17, %v532_v41 }
 0x2af   : > { %v902_v16 = vrot.slane %v901_v9, 1  ;;  %962 = vst.msk [vmem:[%s1690_s30 + $0x8] sm:$0xff] %vm479_vm6, %v959_v11  ;;  %v861_v22 = vadd.f32 %v860_v14, %v859_v6  ;;  %v922_v26 = vsel %vm921_vm0, %v585_v24, %v578_v47 }
 0x2b1   : > { %v903_v35 = vadd.f32 %v902_v16, %v901_v9  ;;  %v946_v21 = vsel %vm911_vm2, %v861_v22, %v854_v20 }
 0x2b2   : > { %v957_v5 = vsel %vm948_vm15, %v942_v25, %v946_v21 }
 0x2b3   : > { %v907_v18 = vsel %vm906_vm5, %v903_v35, %v896_v52  ;;  %v960_v57 = vmul.f32 0.015625, %v957_v5 }
 0x2b4   : > { %v949_v33 = vsel %vm948_vm15, %v907_v18, %v912_v56 }
 0x2b5   : > { %v951_v61 = vsel %vm950_vm8, %v949_v33, %v917_v19  ;;  %964 = vst.msk [vmem:[%s1690_s30 + $0x10] sm:$0xf] %vm963_vm4, %v960_v57 }
 0x2b6   : > { %v953_v40 = vsel %vm952_vm3, %v951_v61, %v922_v26 }
 0x2b7   : > { %v958_v34 = vmul.f32 0.015625, %v953_v40 }
 0x2b9   : > { %961 = vst.msk [vmem:[%s1690_s30] sm:$0xff] %vm479_vm6, %v958_v34 }
 0x2ba PF: > { %p12_p7 = scmp.ge.s32.totalorder %s1225_s14, 4   ;;  %s1776_s9 = smov %s1171_s10 }
 0x2bb   : > { %s1777_s10 = smov %s1175_s11  ;;  %s1778_s11 = smov %s1235_s17 }
 0x2bc   : > { %s1779_s12 = smov %s1225_s14  ;;  %14 = sbr.rel (!%p12_p7) target bundleno = 3 (0x3), region = 68 }
 0x2c1   :  { %986 = vsyncpa [#allocation3], 1 }
 0x2c2   :  { %988 = vsyncpa [#allocation3 + $0x1], 1 }

</bundles_post_ra>
